<compile_context>
chip_gen: v7x
topology: tpu7x:2x2x1
jax: 0.10.0
libtpu: 0.0.40
codegen_flags: <defaults>
</compile_context>

<pallas_src>
import functools
import math

import jax
import jax.numpy as jnp
from jax.experimental import pallas as pl
from jax.experimental.pallas import tpu as pltpu  # noqa: F401  (TPU backend assumed)

PAD_N = 128            # lane-dense classifier output width (real classes sliced outside)
NEG_MASK = -10000.0    # additive key-mask bias


def _round_up(x, m):
    return (x + m - 1) // m * m


def _gelu(x):
    # tanh approximation of GELU ('gelu_new').
    # TODO(synk): PyTorch nn.GELU default is the exact erf form; erf has no clean Mosaic
    # lowering here, so the tanh approximation is used (~1e-3 level difference).
    return 0.5 * x * (1.0 + jnp.tanh(0.7978845608028654 * (x + 0.044715 * x * x * x)))


def _layernorm(x, g, b, eps):
    mu = jnp.mean(x, axis=-1, keepdims=True)
    xc = x - mu
    var = jnp.mean(xc * xc, axis=-1, keepdims=True)
    return xc * jax.lax.rsqrt(var + eps) * g + b


# ----------------------------- fused kernel -----------------------------

def fused_bert_kernel(ids_ref, mask_ref, emb_ref, prm_ref, w_ref, out_ref,
                      *, batch, seq, hidden, num_heads, ffn, eps,
                      vocab_pad, pos_rows, w_offs, prm_rows):
    H, nh = hidden, num_heads
    Dh = H // nh
    BS = batch * seq

    # ---- static slab accessors ------------------------------------------------
    def weight(name):                       # bf16 (rows, cols) slice of the weight slab
        r0, rows, cols = w_offs[name]
        return w_ref[r0:r0 + rows, 0:cols]

    def prm(name):                          # f32 (1, cols) slice of the param slab
        r, cols = prm_rows[name]
        return prm_ref[r:r + 1, 0:cols]

    def proj(a_f32, wname, bname):
        # bf16 MXU inputs, f32 accumulation, f32 bias add.
        return jnp.dot(a_f32.astype(jnp.bfloat16), weight(wname),
                       preferred_element_type=jnp.float32) + prm(bname)

    # ---- embeddings: in-kernel gather (one-hot matmul) -------------------------
    ids = ids_ref[...]                                          # (B*S, 2) int32
    tok = ids[:, 0:1]                                           # (B*S, 1)
    seg = ids[:, 1:2].astype(jnp.float32)                       # (B*S, 1) in {0, 1}

    word_oh = (tok == jax.lax.broadcasted_iota(jnp.int32, (BS, vocab_pad), 1)
               ).astype(jnp.float32)                            # (B*S, Vp)
    word_part = jnp.dot(word_oh, emb_ref[0:vocab_pad, :],
                        preferred_element_type=jnp.float32)     # (B*S, H)

    t0 = emb_ref[vocab_pad + pos_rows:vocab_pad + pos_rows + 1, :]      # (1, H)
    t1 = emb_ref[vocab_pad + pos_rows + 1:vocab_pad + pos_rows + 2, :]  # (1, H)
    type_part = (1.0 - seg) * t0 + seg * t1                     # (B*S, H)

    pos_tbl = emb_ref[vocab_pad:vocab_pad + seq, :]             # (S, H)
    emb = ((word_part + type_part).reshape(batch, seq, H)
           + pos_tbl[None, :, :]).reshape(BS, H)

    # ---- embedding LayerNorm (f32) ----------------------------------------------
    x = _layernorm(emb, prm("emb_ln_g"), prm("emb_ln_b"), eps)  # (B*S, H)

    # ---- fused QKV projection (1/sqrt(Dh) folded into the Q weight at init) ------
    qkv = proj(x, "wqkv", "bqkv")                               # (B*S, 3H) f32
    q = qkv[:, 0:H].reshape(batch, seq, H)
    k = qkv[:, H:2 * H].reshape(batch, seq, H)
    v = qkv[:, 2 * H:3 * H].reshape(batch, seq, H)

    # additive key mask computed in-kernel, broadcast over query rows: (B, 1, S)
    bias = ((1.0 - mask_ref[...]) * NEG_MASK)[:, None, :]

    # ---- self-attention: batched over B, small static unroll over heads ----------
    ctx_heads = []
    for h in range(nh):
        sl = slice(h * Dh, (h + 1) * Dh)
        s = jnp.einsum("bqd,bkd->bqk", q[:, :, sl], k[:, :, sl],
                       preferred_element_type=jnp.float32) + bias       # (B, S, S)
        m = jnp.max(s, axis=-1, keepdims=True)
        p = jnp.exp(s - m)
        p = p * pl.reciprocal(jnp.sum(p, axis=-1, keepdims=True), approx=True)
        ctx_heads.append(jnp.einsum("bqk,bkd->bqd", p, v[:, :, sl],
                                    preferred_element_type=jnp.float32))
    ctx = jnp.concatenate(ctx_heads, axis=-1).reshape(BS, H)            # (B*S, H)

    # ---- attention output projection + residual + LN -----------------------------
    x = _layernorm(x + proj(ctx, "wo", "bo"),
                   prm("attn_ln_g"), prm("attn_ln_b"), eps)

    # ---- feed-forward + residual + LN ---------------------------------------------
    h1 = _gelu(proj(x, "w1", "b1"))
    x = _layernorm(x + proj(h1, "w2", "b2"),
                   prm("ffn_ln_g"), prm("ffn_ln_b"), eps)

    # ---- pooler: tanh(Linear(hidden_states[:, 0])) ---------------------------------
    cls = x.reshape(batch, seq, H)[:, 0:1, :].reshape(batch, H)          # (B, H)
    pooled = jnp.tanh(proj(cls, "wp", "bp"))

    # ---- dropout (inference: identity) + classifier into lane-dense 128-wide slab --
    # TODO(synk): training-mode dropout would need an RNG mask (pltpu.prng_*); inference
    # dropout is the identity, matching eval-mode PyTorch.
    out_ref[...] = proj(pooled, "wc", "bc").astype(out_ref.dtype)


# ----------------------------- parameters -----------------------------

def init_params(key, vocab=100, max_pos=8, type_vocab=2,
                hidden=32, num_heads=4, ffn=64, num_classes=7):
    ks = jax.random.split(key, 11)
    n = lambda k, s: (0.02 * jax.random.normal(k, s)).astype(jnp.float32)
    z = lambda s: jnp.zeros(s, jnp.float32)
    o = lambda s: jnp.ones(s, jnp.float32)

    H, F = hidden, ffn
    Dh = H // num_heads

    # --- raw projection weights (f32) ---
    wq = n(ks[3], (H, H)) * (1.0 / math.sqrt(Dh))   # fold attention scale into Q weight
    wk = n(ks[4], (H, H))
    wv = n(ks[5], (H, H))
    wqkv = jnp.concatenate([wq, wk, wv], axis=1)                         # (H, 3H)
    wo = n(ks[6], (H, H))
    w1 = n(ks[7], (H, F))
    w2 = n(ks[8], (F, H))
    wp = n(ks[9], (H, H))
    wc = jnp.zeros((H, PAD_N), jnp.float32).at[:, :num_classes].set(
        n(ks[10], (H, num_classes)))                                     # lane-dense pad

    # --- pack all projection weights into ONE bf16 slab (16-row-aligned offsets) ---
    blocks = [("wqkv", wqkv), ("wo", wo), ("w1", w1), ("w2", w2), ("wp", wp), ("wc", wc)]
    w_offs, r = {}, 0
    for name, w in blocks:
        w_offs[name] = (r, w.shape[0], w.shape[1])
        r += _round_up(w.shape[0], 16)              # bf16 sublane tile = 16 rows
    w_slab = jnp.zeros((r, PAD_N), jnp.float32)
    for name, w in blocks:
        r0, rows, cols = w_offs[name]
        w_slab = w_slab.at[r0:r0 + rows, :cols].set(w)
    w_slab = w_slab.astype(jnp.bfloat16)

    # --- pack every bias / LayerNorm param into ONE f32 slab (one 128-wide row each) ---
    # NOTE: if bqkv were nonzero, its Q third would also need the 1/sqrt(Dh) scale.
    prm_list = [
        ("emb_ln_g", o((1, H))), ("emb_ln_b", z((1, H))),
        ("bqkv", z((1, 3 * H))), ("bo", z((1, H))),
        ("attn_ln_g", o((1, H))), ("attn_ln_b", z((1, H))),
        ("b1", z((1, F))), ("b2", z((1, H))),
        ("ffn_ln_g", o((1, H))), ("ffn_ln_b", z((1, H))),
        ("bp", z((1, H))), ("bc", z((1, PAD_N))),
    ]
    prm_rows = {name: (i, val.shape[1]) for i, (name, val) in enumerate(prm_list)}
    prm_slab = jnp.zeros((_round_up(len(prm_list), 8), PAD_N), jnp.float32)
    for i, (name, val) in enumerate(prm_list):
        prm_slab = prm_slab.at[i:i + 1, :val.shape[1]].set(val)

    # --- pack word / position / token-type embedding tables into ONE f32 slab ---
    vocab_pad = _round_up(vocab, 8)
    pos_rows = _round_up(max_pos, 8)
    emb_slab = jnp.zeros((vocab_pad + pos_rows + type_vocab, H), jnp.float32)
    emb_slab = emb_slab.at[:vocab, :].set(n(ks[0], (vocab, H)))
    emb_slab = emb_slab.at[vocab_pad:vocab_pad + max_pos, :].set(n(ks[1], (max_pos, H)))
    emb_slab = emb_slab.at[vocab_pad + pos_rows:vocab_pad + pos_rows + type_vocab, :].set(
        n(ks[2], (type_vocab, H)))

    cfg = dict(hidden=H, num_heads=num_heads, ffn=F, num_classes=num_classes,
               vocab_pad=vocab_pad, pos_rows=pos_rows,
               w_offs=w_offs, prm_rows=prm_rows)
    return dict(w_slab=w_slab, prm_slab=prm_slab, emb_slab=emb_slab, cfg=cfg)


# ----------------------------- forward -----------------------------

def bert_classifier_forward(params, token_ids, attention_mask, segment_ids):
    B, S = token_ids.shape
    cfg = params["cfg"]

    # Pack the two id streams into one int32 operand; mask stays f32 (bias math in-kernel).
    ids = jnp.stack([token_ids.astype(jnp.int32),            # .long() equivalent
                     segment_ids.astype(jnp.int32)], axis=-1).reshape(B * S, 2)
    mask = attention_mask.astype(jnp.float32)                 # .float() equivalent

    kernel = functools.partial(
        fused_bert_kernel,
        batch=B, seq=S, hidden=cfg["hidden"], num_heads=cfg["num_heads"],
        ffn=cfg["ffn"], eps=1e-12, vocab_pad=cfg["vocab_pad"],
        pos_rows=cfg["pos_rows"], w_offs=cfg["w_offs"], prm_rows=cfg["prm_rows"])

    logits_pad = pl.pallas_call(
        kernel,
        out_shape=jax.ShapeDtypeStruct((B, PAD_N), jnp.float32),
    )(ids, mask, params["emb_slab"], params["prm_slab"], params["w_slab"])

    return logits_pad[:, :cfg["num_classes"]]                  # (B, num_classes)


# ----------------------------- main -----------------------------

if __name__ == "__main__":
    B, S = 2, 8
    HIDDEN, HEADS, FFN, CLASSES, VOCAB = 32, 4, 64, 7, 100

    key = jax.random.PRNGKey(0)
    k_par, k_tok, k_seg = jax.random.split(key, 3)

    params = init_params(k_par, vocab=VOCAB, max_pos=S, hidden=HIDDEN,
                         num_heads=HEADS, ffn=FFN, num_classes=CLASSES)

    token_ids = jax.random.randint(k_tok, (B, S), 0, VOCAB, dtype=jnp.int32)
    segment_ids = jax.random.randint(k_seg, (B, S), 0, 2, dtype=jnp.int32)
    # mask out the last two tokens of the second example
    attention_mask = jnp.ones((B, S), jnp.float32).at[1, -2:].set(0.0)

    logits = bert_classifier_forward(params, token_ids, attention_mask, segment_ids)
    logits = jax.block_until_ready(logits)
    assert logits.shape == (B, CLASSES) and logits.dtype == jnp.float32
    assert bool(jnp.all(jnp.isfinite(logits)))
    print("KERNEL_OK")
</pallas_src>

<mosaic_0001>
module attributes {stable_mosaic.version = 11 : i64} {
  func.func @fused_bert_kernel(%arg0: memref<16x2xi32, #tpu.memory_space<vmem>>, %arg1: memref<2x8xf32, #tpu.memory_space<vmem>>, %arg2: memref<114x32xf32, #tpu.memory_space<vmem>>, %arg3: memref<16x128xf32, #tpu.memory_space<vmem>>, %arg4: memref<224x128xbf16, #tpu.memory_space<vmem>>, %arg5: memref<2x128xf32, #tpu.memory_space<vmem>>) attributes {dimension_semantics = [], scalar_prefetch = 0 : i64, scratch_operands = 0 : i64, tpu.core_type = #tpu.core_type<tc>} {
    %c0 = arith.constant 0 : index
    %c0_0 = arith.constant 0 : index
    %0 = vector.load %arg0[%c0, %c0_0] : memref<16x2xi32, #tpu.memory_space<vmem>>, vector<16x2xi32>
    %1 = vector.extract_strided_slice %0 {offsets = [0, 0], sizes = [16, 1], strides = [1, 1]} : vector<16x2xi32> to vector<16x1xi32>
    %2 = vector.extract_strided_slice %0 {offsets = [0, 1], sizes = [16, 1], strides = [1, 1]} : vector<16x2xi32> to vector<16x1xi32>
    %3 = arith.sitofp %2 : vector<16x1xi32> to vector<16x1xf32>
    %4 = tpu.iota {dimensions = array<i32: 1>} : vector<16x104xi32>
    %5 = vector.broadcast %1 : vector<16x1xi32> to vector<16x104xi32>
    %6 = arith.cmpi eq, %5, %4 : vector<16x104xi32>
    %7 = arith.extui %6 : vector<16x104xi1> to vector<16x104xi32>
    %8 = arith.sitofp %7 : vector<16x104xi32> to vector<16x104xf32>
    %c0_1 = arith.constant 0 : index
    %c0_2 = arith.constant 0 : index
    %9 = vector.load %arg2[%c0_1, %c0_2] : memref<114x32xf32, #tpu.memory_space<vmem>>, vector<104x32xf32>
    %cst = arith.constant dense<0.000000e+00> : vector<16x32xf32>
    %10 = tpu.matmul %8, %9, %cst {dimension_numbers = #tpu.dot_dimension_numbers<[1], [0], [0], [1], [0, 0, 1, 1], [], []>} : vector<16x104xf32>, vector<104x32xf32>, vector<16x32xf32> -> vector<16x32xf32>
    %c112 = arith.constant 112 : index
    %c0_3 = arith.constant 0 : index
    %11 = vector.load %arg2[%c112, %c0_3] : memref<114x32xf32, #tpu.memory_space<vmem>>, vector<1x32xf32>
    %c113 = arith.constant 113 : index
    %c0_4 = arith.constant 0 : index
    %12 = vector.load %arg2[%c113, %c0_4] : memref<114x32xf32, #tpu.memory_space<vmem>>, vector<1x32xf32>
    %cst_5 = arith.constant 1.000000e+00 : f32
    %13 = vector.broadcast %cst_5 : f32 to vector<16x1xf32>
    %14 = arith.subf %13, %3 : vector<16x1xf32>
    %15 = vector.broadcast %14 : vector<16x1xf32> to vector<16x32xf32>
    %16 = vector.broadcast %11 : vector<1x32xf32> to vector<16x32xf32>
    %17 = arith.mulf %15, %16 : vector<16x32xf32>
    %18 = vector.broadcast %3 : vector<16x1xf32> to vector<16x32xf32>
    %19 = vector.broadcast %12 : vector<1x32xf32> to vector<16x32xf32>
    %20 = arith.mulf %18, %19 : vector<16x32xf32>
    %21 = arith.addf %17, %20 : vector<16x32xf32>
    %c104 = arith.constant 104 : index
    %c0_6 = arith.constant 0 : index
    %22 = vector.load %arg2[%c104, %c0_6] : memref<114x32xf32, #tpu.memory_space<vmem>>, vector<8x32xf32>
    %23 = arith.addf %10, %21 : vector<16x32xf32>
    %24 = vector.shape_cast %23 : vector<16x32xf32> to vector<2x8x32xf32>
    %25 = vector.shape_cast %22 : vector<8x32xf32> to vector<1x8x32xf32>
    %26 = vector.broadcast %25 : vector<1x8x32xf32> to vector<2x8x32xf32>
    %27 = arith.addf %24, %26 : vector<2x8x32xf32>
    %28 = vector.shape_cast %27 : vector<2x8x32xf32> to vector<16x32xf32>
    %c0_7 = arith.constant 0 : index
    %c0_8 = arith.constant 0 : index
    %29 = vector.load %arg3[%c0_7, %c0_8] : memref<16x128xf32, #tpu.memory_space<vmem>>, vector<1x32xf32>
    %c1 = arith.constant 1 : index
    %c0_9 = arith.constant 0 : index
    %30 = vector.load %arg3[%c1, %c0_9] : memref<16x128xf32, #tpu.memory_space<vmem>>, vector<1x32xf32>
    %cst_10 = arith.constant dense<0.000000e+00> : vector<16xf32>
    %31 = vector.multi_reduction <add>, %28, %cst_10 [1] : vector<16x32xf32> to vector<16xf32>
    %32 = vector.shape_cast %31 : vector<16xf32> to vector<16x1xf32>
    %cst_11 = arith.constant 3.200000e+01 : f32
    %33 = vector.broadcast %cst_11 : f32 to vector<16x1xf32>
    %34 = arith.divf %32, %33 : vector<16x1xf32>
    %35 = vector.broadcast %34 : vector<16x1xf32> to vector<16x32xf32>
    %36 = arith.subf %28, %35 : vector<16x32xf32>
    %37 = arith.mulf %36, %36 : vector<16x32xf32>
    %cst_12 = arith.constant dense<0.000000e+00> : vector<16xf32>
    %38 = vector.multi_reduction <add>, %37, %cst_12 [1] : vector<16x32xf32> to vector<16xf32>
    %39 = vector.shape_cast %38 : vector<16xf32> to vector<16x1xf32>
    %cst_13 = arith.constant 3.200000e+01 : f32
    %40 = vector.broadcast %cst_13 : f32 to vector<16x1xf32>
    %41 = arith.divf %39, %40 : vector<16x1xf32>
    %cst_14 = arith.constant 9.99999996E-13 : f32
    %42 = vector.broadcast %cst_14 : f32 to vector<16x1xf32>
    %43 = arith.addf %41, %42 : vector<16x1xf32>
    %44 = math.rsqrt %43 : vector<16x1xf32>
    %45 = vector.broadcast %44 : vector<16x1xf32> to vector<16x32xf32>
    %46 = arith.mulf %36, %45 : vector<16x32xf32>
    %47 = vector.broadcast %29 : vector<1x32xf32> to vector<16x32xf32>
    %48 = arith.mulf %46, %47 : vector<16x32xf32>
    %49 = vector.broadcast %30 : vector<1x32xf32> to vector<16x32xf32>
    %50 = arith.addf %48, %49 : vector<16x32xf32>
    %51 = arith.truncf %50 : vector<16x32xf32> to vector<16x32xbf16>
    %c0_15 = arith.constant 0 : index
    %c0_16 = arith.constant 0 : index
    %52 = vector.load %arg4[%c0_15, %c0_16] : memref<224x128xbf16, #tpu.memory_space<vmem>>, vector<32x96xbf16>
    %cst_17 = arith.constant dense<0.000000e+00> : vector<16x96xf32>
    %53 = tpu.matmul %51, %52, %cst_17 {dimension_numbers = #tpu.dot_dimension_numbers<[1], [0], [0], [1], [0, 0, 1, 1], [], []>} : vector<16x32xbf16>, vector<32x96xbf16>, vector<16x96xf32> -> vector<16x96xf32>
    %c2 = arith.constant 2 : index
    %c0_18 = arith.constant 0 : index
    %54 = vector.load %arg3[%c2, %c0_18] : memref<16x128xf32, #tpu.memory_space<vmem>>, vector<1x96xf32>
    %55 = vector.broadcast %54 : vector<1x96xf32> to vector<16x96xf32>
    %56 = arith.addf %53, %55 : vector<16x96xf32>
    %57 = vector.extract_strided_slice %56 {offsets = [0, 0], sizes = [16, 32], strides = [1, 1]} : vector<16x96xf32> to vector<16x32xf32>
    %58 = vector.shape_cast %57 : vector<16x32xf32> to vector<2x8x32xf32>
    %59 = vector.extract_strided_slice %56 {offsets = [0, 32], sizes = [16, 32], strides = [1, 1]} : vector<16x96xf32> to vector<16x32xf32>
    %60 = vector.shape_cast %59 : vector<16x32xf32> to vector<2x8x32xf32>
    %61 = vector.extract_strided_slice %56 {offsets = [0, 64], sizes = [16, 32], strides = [1, 1]} : vector<16x96xf32> to vector<16x32xf32>
    %62 = vector.shape_cast %61 : vector<16x32xf32> to vector<2x8x32xf32>
    %c0_19 = arith.constant 0 : index
    %c0_20 = arith.constant 0 : index
    %63 = vector.load %arg1[%c0_19, %c0_20] : memref<2x8xf32, #tpu.memory_space<vmem>>, vector<2x8xf32>
    %cst_21 = arith.constant 1.000000e+00 : f32
    %64 = vector.broadcast %cst_21 : f32 to vector<2x8xf32>
    %65 = arith.subf %64, %63 : vector<2x8xf32>
    %cst_22 = arith.constant -1.000000e+04 : f32
    %66 = vector.broadcast %cst_22 : f32 to vector<2x8xf32>
    %67 = arith.mulf %65, %66 : vector<2x8xf32>
    %68 = vector.shape_cast %67 : vector<2x8xf32> to vector<2x1x8xf32>
    %69 = vector.extract_strided_slice %58 {offsets = [0, 0, 0], sizes = [2, 8, 8], strides = [1, 1, 1]} : vector<2x8x32xf32> to vector<2x8x8xf32>
    %70 = vector.extract_strided_slice %60 {offsets = [0, 0, 0], sizes = [2, 8, 8], strides = [1, 1, 1]} : vector<2x8x32xf32> to vector<2x8x8xf32>
    "tpu.trace_start"() <{level = 10 : i32, message = "bqd,bkd->bqk"}> : () -> ()
    %cst_23 = arith.constant dense<0.000000e+00> : vector<2x8x8xf32>
    %71 = tpu.matmul %69, %70, %cst_23 {dimension_numbers = #tpu.dot_dimension_numbers<[2], [2], [1], [1], [0, 0, 0, 1, 1, 1], [0], [0]>} : vector<2x8x8xf32>, vector<2x8x8xf32>, vector<2x8x8xf32> -> vector<2x8x8xf32>
    "tpu.trace_stop"() : () -> ()
    %72 = vector.broadcast %68 : vector<2x1x8xf32> to vector<2x8x8xf32>
    %73 = arith.addf %71, %72 : vector<2x8x8xf32>
    %cst_24 = arith.constant dense<0xFF800000> : vector<2x8xf32>
    %74 = vector.multi_reduction <maximumf>, %73, %cst_24 [2] : vector<2x8x8xf32> to vector<2x8xf32>
    %75 = vector.shape_cast %74 : vector<2x8xf32> to vector<2x8x1xf32>
    %76 = vector.broadcast %75 : vector<2x8x1xf32> to vector<2x8x8xf32>
    %77 = arith.subf %73, %76 : vector<2x8x8xf32>
    %78 = math.exp %77 : vector<2x8x8xf32>
    %cst_25 = arith.constant dense<0.000000e+00> : vector<2x8xf32>
    %79 = vector.multi_reduction <add>, %78, %cst_25 [2] : vector<2x8x8xf32> to vector<2x8xf32>
    %80 = vector.shape_cast %79 : vector<2x8xf32> to vector<2x8x1xf32>
    %81 = tpu.reciprocal %80 {approx = true} : vector<2x8x1xf32> -> vector<2x8x1xf32>
    %82 = vector.broadcast %81 : vector<2x8x1xf32> to vector<2x8x8xf32>
    %83 = arith.mulf %78, %82 : vector<2x8x8xf32>
    %84 = vector.extract_strided_slice %62 {offsets = [0, 0, 0], sizes = [2, 8, 8], strides = [1, 1, 1]} : vector<2x8x32xf32> to vector<2x8x8xf32>
    "tpu.trace_start"() <{level = 10 : i32, message = "bqk,bkd->bqd"}> : () -> ()
    %cst_26 = arith.constant dense<0.000000e+00> : vector<2x8x8xf32>
    %85 = tpu.matmul %83, %84, %cst_26 {dimension_numbers = #tpu.dot_dimension_numbers<[2], [1], [1], [2], [0, 0, 0, 1, 1, 2], [0], [0]>} : vector<2x8x8xf32>, vector<2x8x8xf32>, vector<2x8x8xf32> -> vector<2x8x8xf32>
    "tpu.trace_stop"() : () -> ()
    %86 = vector.extract_strided_slice %58 {offsets = [0, 0, 8], sizes = [2, 8, 8], strides = [1, 1, 1]} : vector<2x8x32xf32> to vector<2x8x8xf32>
    %87 = vector.extract_strided_slice %60 {offsets = [0, 0, 8], sizes = [2, 8, 8], strides = [1, 1, 1]} : vector<2x8x32xf32> to vector<2x8x8xf32>
    "tpu.trace_start"() <{level = 10 : i32, message = "bqd,bkd->bqk"}> : () -> ()
    %cst_27 = arith.constant dense<0.000000e+00> : vector<2x8x8xf32>
    %88 = tpu.matmul %86, %87, %cst_27 {dimension_numbers = #tpu.dot_dimension_numbers<[2], [2], [1], [1], [0, 0, 0, 1, 1, 1], [0], [0]>} : vector<2x8x8xf32>, vector<2x8x8xf32>, vector<2x8x8xf32> -> vector<2x8x8xf32>
    "tpu.trace_stop"() : () -> ()
    %89 = vector.broadcast %68 : vector<2x1x8xf32> to vector<2x8x8xf32>
    %90 = arith.addf %88, %89 : vector<2x8x8xf32>
    %cst_28 = arith.constant dense<0xFF800000> : vector<2x8xf32>
    %91 = vector.multi_reduction <maximumf>, %90, %cst_28 [2] : vector<2x8x8xf32> to vector<2x8xf32>
    %92 = vector.shape_cast %91 : vector<2x8xf32> to vector<2x8x1xf32>
    %93 = vector.broadcast %92 : vector<2x8x1xf32> to vector<2x8x8xf32>
    %94 = arith.subf %90, %93 : vector<2x8x8xf32>
    %95 = math.exp %94 : vector<2x8x8xf32>
    %cst_29 = arith.constant dense<0.000000e+00> : vector<2x8xf32>
    %96 = vector.multi_reduction <add>, %95, %cst_29 [2] : vector<2x8x8xf32> to vector<2x8xf32>
    %97 = vector.shape_cast %96 : vector<2x8xf32> to vector<2x8x1xf32>
    %98 = tpu.reciprocal %97 {approx = true} : vector<2x8x1xf32> -> vector<2x8x1xf32>
    %99 = vector.broadcast %98 : vector<2x8x1xf32> to vector<2x8x8xf32>
    %100 = arith.mulf %95, %99 : vector<2x8x8xf32>
    %101 = vector.extract_strided_slice %62 {offsets = [0, 0, 8], sizes = [2, 8, 8], strides = [1, 1, 1]} : vector<2x8x32xf32> to vector<2x8x8xf32>
    "tpu.trace_start"() <{level = 10 : i32, message = "bqk,bkd->bqd"}> : () -> ()
    %cst_30 = arith.constant dense<0.000000e+00> : vector<2x8x8xf32>
    %102 = tpu.matmul %100, %101, %cst_30 {dimension_numbers = #tpu.dot_dimension_numbers<[2], [1], [1], [2], [0, 0, 0, 1, 1, 2], [0], [0]>} : vector<2x8x8xf32>, vector<2x8x8xf32>, vector<2x8x8xf32> -> vector<2x8x8xf32>
    "tpu.trace_stop"() : () -> ()
    %103 = vector.extract_strided_slice %58 {offsets = [0, 0, 16], sizes = [2, 8, 8], strides = [1, 1, 1]} : vector<2x8x32xf32> to vector<2x8x8xf32>
    %104 = vector.extract_strided_slice %60 {offsets = [0, 0, 16], sizes = [2, 8, 8], strides = [1, 1, 1]} : vector<2x8x32xf32> to vector<2x8x8xf32>
    "tpu.trace_start"() <{level = 10 : i32, message = "bqd,bkd->bqk"}> : () -> ()
    %cst_31 = arith.constant dense<0.000000e+00> : vector<2x8x8xf32>
    %105 = tpu.matmul %103, %104, %cst_31 {dimension_numbers = #tpu.dot_dimension_numbers<[2], [2], [1], [1], [0, 0, 0, 1, 1, 1], [0], [0]>} : vector<2x8x8xf32>, vector<2x8x8xf32>, vector<2x8x8xf32> -> vector<2x8x8xf32>
    "tpu.trace_stop"() : () -> ()
    %106 = vector.broadcast %68 : vector<2x1x8xf32> to vector<2x8x8xf32>
    %107 = arith.addf %105, %106 : vector<2x8x8xf32>
    %cst_32 = arith.constant dense<0xFF800000> : vector<2x8xf32>
    %108 = vector.multi_reduction <maximumf>, %107, %cst_32 [2] : vector<2x8x8xf32> to vector<2x8xf32>
    %109 = vector.shape_cast %108 : vector<2x8xf32> to vector<2x8x1xf32>
    %110 = vector.broadcast %109 : vector<2x8x1xf32> to vector<2x8x8xf32>
    %111 = arith.subf %107, %110 : vector<2x8x8xf32>
    %112 = math.exp %111 : vector<2x8x8xf32>
    %cst_33 = arith.constant dense<0.000000e+00> : vector<2x8xf32>
    %113 = vector.multi_reduction <add>, %112, %cst_33 [2] : vector<2x8x8xf32> to vector<2x8xf32>
    %114 = vector.shape_cast %113 : vector<2x8xf32> to vector<2x8x1xf32>
    %115 = tpu.reciprocal %114 {approx = true} : vector<2x8x1xf32> -> vector<2x8x1xf32>
    %116 = vector.broadcast %115 : vector<2x8x1xf32> to vector<2x8x8xf32>
    %117 = arith.mulf %112, %116 : vector<2x8x8xf32>
    %118 = vector.extract_strided_slice %62 {offsets = [0, 0, 16], sizes = [2, 8, 8], strides = [1, 1, 1]} : vector<2x8x32xf32> to vector<2x8x8xf32>
    "tpu.trace_start"() <{level = 10 : i32, message = "bqk,bkd->bqd"}> : () -> ()
    %cst_34 = arith.constant dense<0.000000e+00> : vector<2x8x8xf32>
    %119 = tpu.matmul %117, %118, %cst_34 {dimension_numbers = #tpu.dot_dimension_numbers<[2], [1], [1], [2], [0, 0, 0, 1, 1, 2], [0], [0]>} : vector<2x8x8xf32>, vector<2x8x8xf32>, vector<2x8x8xf32> -> vector<2x8x8xf32>
    "tpu.trace_stop"() : () -> ()
    %120 = vector.extract_strided_slice %58 {offsets = [0, 0, 24], sizes = [2, 8, 8], strides = [1, 1, 1]} : vector<2x8x32xf32> to vector<2x8x8xf32>
    %121 = vector.extract_strided_slice %60 {offsets = [0, 0, 24], sizes = [2, 8, 8], strides = [1, 1, 1]} : vector<2x8x32xf32> to vector<2x8x8xf32>
    "tpu.trace_start"() <{level = 10 : i32, message = "bqd,bkd->bqk"}> : () -> ()
    %cst_35 = arith.constant dense<0.000000e+00> : vector<2x8x8xf32>
    %122 = tpu.matmul %120, %121, %cst_35 {dimension_numbers = #tpu.dot_dimension_numbers<[2], [2], [1], [1], [0, 0, 0, 1, 1, 1], [0], [0]>} : vector<2x8x8xf32>, vector<2x8x8xf32>, vector<2x8x8xf32> -> vector<2x8x8xf32>
    "tpu.trace_stop"() : () -> ()
    %123 = vector.broadcast %68 : vector<2x1x8xf32> to vector<2x8x8xf32>
    %124 = arith.addf %122, %123 : vector<2x8x8xf32>
    %cst_36 = arith.constant dense<0xFF800000> : vector<2x8xf32>
    %125 = vector.multi_reduction <maximumf>, %124, %cst_36 [2] : vector<2x8x8xf32> to vector<2x8xf32>
    %126 = vector.shape_cast %125 : vector<2x8xf32> to vector<2x8x1xf32>
    %127 = vector.broadcast %126 : vector<2x8x1xf32> to vector<2x8x8xf32>
    %128 = arith.subf %124, %127 : vector<2x8x8xf32>
    %129 = math.exp %128 : vector<2x8x8xf32>
    %cst_37 = arith.constant dense<0.000000e+00> : vector<2x8xf32>
    %130 = vector.multi_reduction <add>, %129, %cst_37 [2] : vector<2x8x8xf32> to vector<2x8xf32>
    %131 = vector.shape_cast %130 : vector<2x8xf32> to vector<2x8x1xf32>
    %132 = tpu.reciprocal %131 {approx = true} : vector<2x8x1xf32> -> vector<2x8x1xf32>
    %133 = vector.broadcast %132 : vector<2x8x1xf32> to vector<2x8x8xf32>
    %134 = arith.mulf %129, %133 : vector<2x8x8xf32>
    %135 = vector.extract_strided_slice %62 {offsets = [0, 0, 24], sizes = [2, 8, 8], strides = [1, 1, 1]} : vector<2x8x32xf32> to vector<2x8x8xf32>
    "tpu.trace_start"() <{level = 10 : i32, message = "bqk,bkd->bqd"}> : () -> ()
    %cst_38 = arith.constant dense<0.000000e+00> : vector<2x8x8xf32>
    %136 = tpu.matmul %134, %135, %cst_38 {dimension_numbers = #tpu.dot_dimension_numbers<[2], [1], [1], [2], [0, 0, 0, 1, 1, 2], [0], [0]>} : vector<2x8x8xf32>, vector<2x8x8xf32>, vector<2x8x8xf32> -> vector<2x8x8xf32>
    "tpu.trace_stop"() : () -> ()
    %137 = tpu.concatenate %85, %102, %119, %136 in 2 : vector<2x8x8xf32>, vector<2x8x8xf32>, vector<2x8x8xf32>, vector<2x8x8xf32> -> vector<2x8x32xf32>
    %138 = vector.shape_cast %137 : vector<2x8x32xf32> to vector<16x32xf32>
    %139 = arith.truncf %138 : vector<16x32xf32> to vector<16x32xbf16>
    %c32 = arith.constant 32 : index
    %c0_39 = arith.constant 0 : index
    %140 = vector.load %arg4[%c32, %c0_39] : memref<224x128xbf16, #tpu.memory_space<vmem>>, vector<32x32xbf16>
    %cst_40 = arith.constant dense<0.000000e+00> : vector<16x32xf32>
    %141 = tpu.matmul %139, %140, %cst_40 {dimension_numbers = #tpu.dot_dimension_numbers<[1], [0], [0], [1], [0, 0, 1, 1], [], []>} : vector<16x32xbf16>, vector<32x32xbf16>, vector<16x32xf32> -> vector<16x32xf32>
    %c3 = arith.constant 3 : index
    %c0_41 = arith.constant 0 : index
    %142 = vector.load %arg3[%c3, %c0_41] : memref<16x128xf32, #tpu.memory_space<vmem>>, vector<1x32xf32>
    %143 = vector.broadcast %142 : vector<1x32xf32> to vector<16x32xf32>
    %144 = arith.addf %141, %143 : vector<16x32xf32>
    %145 = arith.addf %50, %144 : vector<16x32xf32>
    %c4 = arith.constant 4 : index
    %c0_42 = arith.constant 0 : index
    %146 = vector.load %arg3[%c4, %c0_42] : memref<16x128xf32, #tpu.memory_space<vmem>>, vector<1x32xf32>
    %c5 = arith.constant 5 : index
    %c0_43 = arith.constant 0 : index
    %147 = vector.load %arg3[%c5, %c0_43] : memref<16x128xf32, #tpu.memory_space<vmem>>, vector<1x32xf32>
    %cst_44 = arith.constant dense<0.000000e+00> : vector<16xf32>
    %148 = vector.multi_reduction <add>, %145, %cst_44 [1] : vector<16x32xf32> to vector<16xf32>
    %149 = vector.shape_cast %148 : vector<16xf32> to vector<16x1xf32>
    %cst_45 = arith.constant 3.200000e+01 : f32
    %150 = vector.broadcast %cst_45 : f32 to vector<16x1xf32>
    %151 = arith.divf %149, %150 : vector<16x1xf32>
    %152 = vector.broadcast %151 : vector<16x1xf32> to vector<16x32xf32>
    %153 = arith.subf %145, %152 : vector<16x32xf32>
    %154 = arith.mulf %153, %153 : vector<16x32xf32>
    %cst_46 = arith.constant dense<0.000000e+00> : vector<16xf32>
    %155 = vector.multi_reduction <add>, %154, %cst_46 [1] : vector<16x32xf32> to vector<16xf32>
    %156 = vector.shape_cast %155 : vector<16xf32> to vector<16x1xf32>
    %cst_47 = arith.constant 3.200000e+01 : f32
    %157 = vector.broadcast %cst_47 : f32 to vector<16x1xf32>
    %158 = arith.divf %156, %157 : vector<16x1xf32>
    %cst_48 = arith.constant 9.99999996E-13 : f32
    %159 = vector.broadcast %cst_48 : f32 to vector<16x1xf32>
    %160 = arith.addf %158, %159 : vector<16x1xf32>
    %161 = math.rsqrt %160 : vector<16x1xf32>
    %162 = vector.broadcast %161 : vector<16x1xf32> to vector<16x32xf32>
    %163 = arith.mulf %153, %162 : vector<16x32xf32>
    %164 = vector.broadcast %146 : vector<1x32xf32> to vector<16x32xf32>
    %165 = arith.mulf %163, %164 : vector<16x32xf32>
    %166 = vector.broadcast %147 : vector<1x32xf32> to vector<16x32xf32>
    %167 = arith.addf %165, %166 : vector<16x32xf32>
    %168 = arith.truncf %167 : vector<16x32xf32> to vector<16x32xbf16>
    %c64 = arith.constant 64 : index
    %c0_49 = arith.constant 0 : index
    %169 = vector.load %arg4[%c64, %c0_49] : memref<224x128xbf16, #tpu.memory_space<vmem>>, vector<32x64xbf16>
    %cst_50 = arith.constant dense<0.000000e+00> : vector<16x64xf32>
    %170 = tpu.matmul %168, %169, %cst_50 {dimension_numbers = #tpu.dot_dimension_numbers<[1], [0], [0], [1], [0, 0, 1, 1], [], []>} : vector<16x32xbf16>, vector<32x64xbf16>, vector<16x64xf32> -> vector<16x64xf32>
    %c6 = arith.constant 6 : index
    %c0_51 = arith.constant 0 : index
    %171 = vector.load %arg3[%c6, %c0_51] : memref<16x128xf32, #tpu.memory_space<vmem>>, vector<1x64xf32>
    %172 = vector.broadcast %171 : vector<1x64xf32> to vector<16x64xf32>
    %173 = arith.addf %170, %172 : vector<16x64xf32>
    %cst_52 = arith.constant 5.000000e-01 : f32
    %174 = vector.broadcast %cst_52 : f32 to vector<16x64xf32>
    %175 = arith.mulf %174, %173 : vector<16x64xf32>
    %cst_53 = arith.constant 4.471500e-02 : f32
    %176 = vector.broadcast %cst_53 : f32 to vector<16x64xf32>
    %177 = arith.mulf %176, %173 : vector<16x64xf32>
    %178 = arith.mulf %177, %173 : vector<16x64xf32>
    %179 = arith.mulf %178, %173 : vector<16x64xf32>
    %180 = arith.addf %173, %179 : vector<16x64xf32>
    %cst_54 = arith.constant 0.797884583 : f32
    %181 = vector.broadcast %cst_54 : f32 to vector<16x64xf32>
    %182 = arith.mulf %181, %180 : vector<16x64xf32>
    %183 = math.tanh %182 : vector<16x64xf32>
    %cst_55 = arith.constant 1.000000e+00 : f32
    %184 = vector.broadcast %cst_55 : f32 to vector<16x64xf32>
    %185 = arith.addf %184, %183 : vector<16x64xf32>
    %186 = arith.mulf %175, %185 : vector<16x64xf32>
    %187 = arith.truncf %186 : vector<16x64xf32> to vector<16x64xbf16>
    %c96 = arith.constant 96 : index
    %c0_56 = arith.constant 0 : index
    %188 = vector.load %arg4[%c96, %c0_56] : memref<224x128xbf16, #tpu.memory_space<vmem>>, vector<64x32xbf16>
    %cst_57 = arith.constant dense<0.000000e+00> : vector<16x32xf32>
    %189 = tpu.matmul %187, %188, %cst_57 {dimension_numbers = #tpu.dot_dimension_numbers<[1], [0], [0], [1], [0, 0, 1, 1], [], []>} : vector<16x64xbf16>, vector<64x32xbf16>, vector<16x32xf32> -> vector<16x32xf32>
    %c7 = arith.constant 7 : index
    %c0_58 = arith.constant 0 : index
    %190 = vector.load %arg3[%c7, %c0_58] : memref<16x128xf32, #tpu.memory_space<vmem>>, vector<1x32xf32>
    %191 = vector.broadcast %190 : vector<1x32xf32> to vector<16x32xf32>
    %192 = arith.addf %189, %191 : vector<16x32xf32>
    %193 = arith.addf %167, %192 : vector<16x32xf32>
    %c8 = arith.constant 8 : index
    %c0_59 = arith.constant 0 : index
    %194 = vector.load %arg3[%c8, %c0_59] : memref<16x128xf32, #tpu.memory_space<vmem>>, vector<1x32xf32>
    %c9 = arith.constant 9 : index
    %c0_60 = arith.constant 0 : index
    %195 = vector.load %arg3[%c9, %c0_60] : memref<16x128xf32, #tpu.memory_space<vmem>>, vector<1x32xf32>
    %cst_61 = arith.constant dense<0.000000e+00> : vector<16xf32>
    %196 = vector.multi_reduction <add>, %193, %cst_61 [1] : vector<16x32xf32> to vector<16xf32>
    %197 = vector.shape_cast %196 : vector<16xf32> to vector<16x1xf32>
    %cst_62 = arith.constant 3.200000e+01 : f32
    %198 = vector.broadcast %cst_62 : f32 to vector<16x1xf32>
    %199 = arith.divf %197, %198 : vector<16x1xf32>
    %200 = vector.broadcast %199 : vector<16x1xf32> to vector<16x32xf32>
    %201 = arith.subf %193, %200 : vector<16x32xf32>
    %202 = arith.mulf %201, %201 : vector<16x32xf32>
    %cst_63 = arith.constant dense<0.000000e+00> : vector<16xf32>
    %203 = vector.multi_reduction <add>, %202, %cst_63 [1] : vector<16x32xf32> to vector<16xf32>
    %204 = vector.shape_cast %203 : vector<16xf32> to vector<16x1xf32>
    %cst_64 = arith.constant 3.200000e+01 : f32
    %205 = vector.broadcast %cst_64 : f32 to vector<16x1xf32>
    %206 = arith.divf %204, %205 : vector<16x1xf32>
    %cst_65 = arith.constant 9.99999996E-13 : f32
    %207 = vector.broadcast %cst_65 : f32 to vector<16x1xf32>
    %208 = arith.addf %206, %207 : vector<16x1xf32>
    %209 = math.rsqrt %208 : vector<16x1xf32>
    %210 = vector.broadcast %209 : vector<16x1xf32> to vector<16x32xf32>
    %211 = arith.mulf %201, %210 : vector<16x32xf32>
    %212 = vector.broadcast %194 : vector<1x32xf32> to vector<16x32xf32>
    %213 = arith.mulf %211, %212 : vector<16x32xf32>
    %214 = vector.broadcast %195 : vector<1x32xf32> to vector<16x32xf32>
    %215 = arith.addf %213, %214 : vector<16x32xf32>
    %216 = vector.shape_cast %215 : vector<16x32xf32> to vector<2x8x32xf32>
    %217 = vector.extract_strided_slice %216 {offsets = [0, 0, 0], sizes = [2, 1, 32], strides = [1, 1, 1]} : vector<2x8x32xf32> to vector<2x1x32xf32>
    %218 = vector.shape_cast %217 : vector<2x1x32xf32> to vector<2x32xf32>
    %219 = arith.truncf %218 : vector<2x32xf32> to vector<2x32xbf16>
    %c160 = arith.constant 160 : index
    %c0_66 = arith.constant 0 : index
    %220 = vector.load %arg4[%c160, %c0_66] : memref<224x128xbf16, #tpu.memory_space<vmem>>, vector<32x32xbf16>
    %cst_67 = arith.constant dense<0.000000e+00> : vector<2x32xf32>
    %221 = tpu.matmul %219, %220, %cst_67 {dimension_numbers = #tpu.dot_dimension_numbers<[1], [0], [0], [1], [0, 0, 1, 1], [], []>} : vector<2x32xbf16>, vector<32x32xbf16>, vector<2x32xf32> -> vector<2x32xf32>
    %c10 = arith.constant 10 : index
    %c0_68 = arith.constant 0 : index
    %222 = vector.load %arg3[%c10, %c0_68] : memref<16x128xf32, #tpu.memory_space<vmem>>, vector<1x32xf32>
    %223 = vector.broadcast %222 : vector<1x32xf32> to vector<2x32xf32>
    %224 = arith.addf %221, %223 : vector<2x32xf32>
    %225 = math.tanh %224 : vector<2x32xf32>
    %226 = arith.truncf %225 : vector<2x32xf32> to vector<2x32xbf16>
    %c192 = arith.constant 192 : index
    %c0_69 = arith.constant 0 : index
    %227 = vector.load %arg4[%c192, %c0_69] : memref<224x128xbf16, #tpu.memory_space<vmem>>, vector<32x128xbf16>
    %cst_70 = arith.constant dense<0.000000e+00> : vector<2x128xf32>
    %228 = tpu.matmul %226, %227, %cst_70 {dimension_numbers = #tpu.dot_dimension_numbers<[1], [0], [0], [1], [0, 0, 1, 1], [], []>} : vector<2x32xbf16>, vector<32x128xbf16>, vector<2x128xf32> -> vector<2x128xf32>
    %c11 = arith.constant 11 : index
    %c0_71 = arith.constant 0 : index
    %229 = vector.load %arg3[%c11, %c0_71] : memref<16x128xf32, #tpu.memory_space<vmem>>, vector<1x128xf32>
    %230 = vector.broadcast %229 : vector<1x128xf32> to vector<2x128xf32>
    %231 = arith.addf %228, %230 : vector<2x128xf32>
    %c0_72 = arith.constant 0 : index
    %c0_73 = arith.constant 0 : index
    %232 = vector.load %arg5[%c0_72, %c0_73] : memref<2x128xf32, #tpu.memory_space<vmem>>, vector<2x128xf32>
    tpu.vector_store %arg5[%c0_72, %c0_73], %231 {strides = array<i32>} : memref<2x128xf32, #tpu.memory_space<vmem>>, vector<2x128xf32>,
    return
  }
}

</mosaic_0001>

<bundles_post_ra>
// kernel: tpu_custom_call.1
= control target key start
LH: loop header
LB: loop body
LE: loop exit
PB: predicated region body
PF: predicated region fallthrough
CT: control target
= control target key end

     0   :  { %v2583_v2 = vmov 0   ;;  %v2584_v13 = vmov 0.0   ;;  %v2585_v21 = vmov 1   ;;  %s2980_s0 = inlined_call_operand.vmem [shape: s32[16,2], index: 0, kind: input, shape index: {}]   ;;  %s2981_s1 = inlined_call_operand.vmem [shape: f32[2,8], index: 1, kind: input, shape index: {}]   ;;  %s2982_s2 = inlined_call_operand.vmem [shape: f32[114,32], index: 2, kind: input, shape index: {}]   ;;  %s2983_s3 = inlined_call_operand.vmem [shape: f32[16,128], index: 3, kind: input, shape index: {}]   ;;  %s2984_s4 = inlined_call_operand.vmem [shape: bf16[224,128], index: 4, kind: input, shape index: {}]   ;;  %s2985_s5 = inlined_call_operand.hbm [shape: f32[2,128], index: 5, kind: output, shape index: {}]  }
   0x1   :  { %v22_v0 = vld [vmem:[%s2980_s0] sm:$0xff]  ;;  %2477 = vset.pattern.permute.xlu0 %v2583_v2  ;;  %v41_v3 = vld [vmem:[%s2982_s2 + $0x8] sm:$0xff]  ;;  %v42_v4 = vld [vmem:[%s2982_s2 + $0x10] sm:$0xff]  ;;  %2301 = vmatprep.subr.bf16.mxu1 %v2584_v13 }
   0x2   :  { %v40_v1 = vld [vmem:[%s2982_s2] sm:$0xff]  ;;  %v43_v5 = vld [vmem:[%s2982_s2 + $0x18] sm:$0xff]  ;;  %29 = vperm.xlu0 %2477, %v22_v0   ;;  %v23_v8 = vld [vmem:[%s2980_s0 + $0x8] sm:$0xff]  ;;  %v24_v11 = vcvt.s32.f32 %v22_v0  ;;  %2479 = vset.pattern.permute.xlu1 %v2585_v21 }
   0x3   :  { %v2433_v6 = vpack.c.bf16 %v41_v3, %v40_v1  ;;  %v2437_v7 = vpack.c.bf16 %v43_v5, %v42_v4  ;;  %v44_v9 = vld [vmem:[%s2982_s2 + $0x20] sm:$0xff]  ;;  %v45_v10 = vld [vmem:[%s2982_s2 + $0x28] sm:$0xff]  ;;  %v25_v12 = vcvt.s32.f32 %v23_v8  ;;  %v46_v14 = vld [vmem:[%s2982_s2 + $0x30] sm:$0xff] }
   0x4   :  { %v47_v15 = vld [vmem:[%s2982_s2 + $0x38] sm:$0xff]  ;;  %v2441_v16 = vpack.c.bf16 %v45_v10, %v44_v9  ;;  %v55_v17 = vsub.f32 1.0, %v24_v11  ;;  %v48_v19 = vld [vmem:[%s2982_s2 + $0x40] sm:$0xff]  ;;  %v49_v20 = vld [vmem:[%s2982_s2 + $0x48] sm:$0xff] }
   0x5   :  { %2434 = vmatprep.subr.bf16.mxu0 %v2433_v6  ;;  %v56_v18 = vsub.f32 1.0, %v25_v12  ;;  %v2445_v22 = vpack.c.bf16 %v47_v15, %v46_v14  ;;  %v50_v23 = vld [vmem:[%s2982_s2 + $0x50] sm:$0xff]  ;;  %v2449_v24 = vpack.c.bf16 %v49_v20, %v48_v19  ;;  %v51_v25 = vld [vmem:[%s2982_s2 + $0x58] sm:$0xff] }
   0x6   :  { %2436 = vmatpush3.bf16.msra.mxu0 %v2433_v6  ;;  %32 = vperm.xlu0 %2477, %v23_v8  }
   0x7   :  { %2438 = vmatprep.subr.bf16.mxu0 %v2437_v7  ;;  %59 = vperm.xlu1 %2479, %v55_v17  }
   0xa   :  { %2440 = vmatpush3.bf16.msra.mxu0 %v2437_v7  ;;  %2478 = vset.pattern.permute.xlu0 %v2585_v21 }
   0xb   :  { %2442 = vmatprep.subr.bf16.mxu0 %v2441_v16  ;;  %75 = vperm.xlu0 %2478, %v24_v11  }
   0xc   :  { %64 = vperm.xlu1 %2479, %v56_v18  }
   0xe   :  { %2444 = vmatpush3.bf16.msra.mxu0 %v2441_v16 }
   0xf   :  { %2446 = vmatprep.subr.bf16.mxu0 %v2445_v22 }
  0x10   :  { %10 = vsyncpa [#allocation3], 0  ;;  %v2453_v26 = vpack.c.bf16 %v51_v25, %v50_v23  ;;  %80 = vperm.xlu1 %2479, %v25_v12   ;;  %v52_v27 = vld [vmem:[%s2982_s2 + $0x60] sm:$0xff]  ;;  %v26_v28 = vlaneseq  ;;  %vm92_vm0 = vcmask 850944   ;;  %v2145_v36 = vld [vmem:[%s2982_s2 + $0x70] ss:$0 sm:$0xff] }
  0x11   :  { %v2146_v37 = vld [vmem:[%s2982_s2 + $0x71] ss:$0 sm:$0xff]  ;;  %v91_v47 = vld [vmem:[%s2982_s2 + $0x68] sm:$0xff]  ;;  %vm178_vm3 = vcmask 261120   ;;  %v2495_v1 = vld [vmem:[%s2984_s4] sm:$0xff]   ;;  %vm2586_vm4 = vmmov 0  }
  0x12   :  { %2448 = vmatpush3.bf16.msra.mxu0 %v2445_v22  ;;  %v27_v29 = vand.u32 127, %v26_v28  ;;  %2302 = vmatpush3.bf16.msra.mxu1 %v2495_v1  ;;  %v2496_v2 = vld [vmem:[%s2984_s4 + $0x8] sm:$0xff]   ;;  %v2149_v10 = vld [vmem:[%s2983_s3] ss:$0 sm:$0xff]  ;;  %v2150_v15 = vld [vmem:[%s2983_s3 + $0x1] ss:$0 sm:$0xff] }
  0x13   :  { %2450 = vmatprep.subr.bf16.mxu0 %v2449_v24  ;;  %2305 = vmatprep.mubr.msk.bf16.mxu1 %vm2586_vm4, %v2584_v13  ;;  %v2151_v21 = vld [vmem:[%s2983_s3 + $0x2] ss:$0 sm:$0xff]  ;;  %s2587_s11 = smov 96   ;;  %vm323_vm5 = vcmask 64512   ;;  %s2590_s14 = smov 88   ;;  %vm1665_vm6 = vcmask 130048  }
  0x14   :  { %2303 = vmatprep.subr.bf16.mxu1 %v2584_v13  ;;  %s2591_s15 = smov 120   ;;  %s2592_s16 = smov 56   ;;  %vm1668_vm7 = vcmask 195584   ;;  %vm1901_vm8 = vcmask 523264   ;;  %vm2004_vm9 = vcmask 1041409  }
  0x15   :  { %s2593_s17 = smov 80   ;;  %s2594_s18 = smov 112  }
  0x16   :  { %2452 = vmatpush3.bf16.msra.mxu0 %v2449_v24  ;;  %2304 = vmatpush3.bf16.msra.mxu1 %v2496_v2  ;;  %s2595_s19 = smov 48   ;;  %s2596_s20 = smov 72  }
  0x17   :  { %2454 = vmatprep.subr.bf16.mxu0 %v2453_v26  ;;  %2309 = vmatprep.subr.mxu1 %v2584_v13  ;;  %s2597_s21 = smov 104   ;;  %s2598_s22 = smov 40  }
  0x18   :  { %s2599_s23 = smov 16   ;;  %s2600_s24 = smov 8  }
  0x19   :  { %s2601_s28 = smov 24  }
  0x1a   :  { %2456 = vmatpush3.bf16.msra.mxu0 %v2453_v26 }
  0x1b   :  { %2296 = vmatprep.subr.mxu0 %v52_v27 }
  0x1e   :  { %2297 = vmatpush3.msra.mxu0 %v52_v27 }
  0x1f   :  { %2329 = vmatprep.subr.mxu0 %v2584_v13 }
  0x81   :  { %v30_v30 = vpop.permute.xlu0 %29 }
  0x82   :  { %vm34_vm1 = vcmp.eq.s32.totalorder %v30_v30, %v27_v29 }
  0x83   :  { %v2143_v31 = vsel %vm34_vm1, 1.0, %v2584_v13 }
  0x84   :  { %2298 = vmatprep.mubr.msk.f32.mxu0 %vm92_vm0, %v2143_v31  ;;  %v2588_v31 = vmov 1966171168  }
  0x85   :  { %v33_v32 = vpop.permute.xlu0 %32 }
  0x86   :  { %vm35_vm2 = vcmp.eq.s32.totalorder %v33_v32, %v27_v29  ;;  %v60_v34 = vpop.permute.xlu1 %59  ;;  %v289_v32 = vunpack.c.l.s4 %v2588_v31 }
  0x87   :  { %v2144_v33 = vsel %vm35_vm2, 1.0, %v2584_v13  ;;  %v71_v42 = vmul.f32 %v2145_v36, %v60_v34 }
  0x88   :  { %2299 = vmatmul.mubr.msk.f32.vlgmr.msra.gmra.mrb[0].mxu0 %vm92_vm0, %v2144_v33  ;;  %v284_v33 = vld [vmem:[%s2981_s1] sm:$0x3]  ;;  %v290_v34 = vunpack.c.0.s8 %v289_v32  ;;  %s2589_s1 = smov 64  }
  0x89   :  { %2331 = vmatprep.mubr.msk.f32.mxu0 %vm2586_vm4, %v2584_v13 }
  0x8a   :  { %v76_v39 = vpop.permute.xlu0 %75 }
  0x8b   :  { %v65_v35 = vpop.permute.xlu1 %64  ;;  %v87_v43 = vmul.f32 %v2146_v37, %v76_v39 }
  0x8c   :  { %v72_v40 = vmul.f32 %v2145_v36, %v65_v35  ;;  %v292_v35 = vshrl.u32 %v26_v28, 7  ;;  %v285_v36 = vsub.f32 1.0, %v284_v33 }
  0x8d   :  { %v89_v46 = vadd.f32 %v87_v43, %v71_v42 }
  0x8f   :  { %v81_v38 = vpop.permute.xlu1 %80 }
  0x90   :  { %v88_v41 = vmul.f32 %v2146_v37, %v81_v38  ;;  %v293_v37 = vsub.s32 %v290_v34, %v292_v35  ;;  %v286_v38 = vmul.f32 -10000.0, %v285_v36 }
  0x92   :  { %v90_v44 = vadd.f32 %v88_v41, %v72_v40  ;;  %v294_v39 = vrot.slane %v286_v38, %v293_v37  ;;  %v312_v40 = vsub.s32 0, %v292_v35 }
  0x94   :  { %v302_v41 = vrot.slane %v294_v39, %v293_v37  ;;  %v295_v42 = vcombine.high %v294_v39, %v294_v39 }
  0x96   :  { %v2748_v43 = vrot.slane %v302_v41, %v312_v40 }
 0x15b   :  { %v2300_v45 = vpop.f32.mrb[0].mxu0 }
 0x15c   :  { %v171_v48 = vadd.f32 %v2300_v45, %v90_v44  ;;  %v165_v49 = vpop.f32.mrb[1].mxu0  ;;  %v309_v44 = vrot.slane %v295_v42, %v293_v37 }
 0x15d   :  { %v166_v50 = vadd.f32 %v165_v49, %v89_v46 }
 0x15e   :  { %v175_v51 = vadd.f32 %v171_v48, %v91_v47  ;;  %v2751_v48 = vrot.slane %v309_v44, %v312_v40 }
 0x15f   :  { %v174_v52 = vadd.f32 %v166_v50, %v91_v47 }
 0x160   :  { %v182_v53 = vsel %vm178_vm3, %v175_v51, 0.0 }
 0x161   :  { %183 = vadd.xlane.f32.xlu0 %v182_v53  ;;  %v179_v54 = vsel %vm178_vm3, %v174_v52, 0.0 }
 0x162   :  { %180 = vadd.xlane.f32.xlu1 %v179_v54 }
 0x1ee   :  { %v184_v55 = vpop.xlane.xlu0 %183 }
 0x1ef   :  { %v187_v56 = vmul.f32 0.03125, %v184_v55  ;;  %v181_v57 = vpop.xlane.xlu1 %180 }
 0x1f0   :  { %v186_v58 = vmul.f32 0.03125, %v181_v57 }
 0x1f1   :  { %v189_v59 = vsub.f32 %v175_v51, %v187_v56 }
 0x1f2   :  { %v188_v60 = vsub.f32 %v174_v52, %v186_v58 }
 0x1f3   :  { %v191_v61 = vmul.f32 %v189_v59, %v189_v59 }
 0x1f4   :  { %v190_v62 = vmul.f32 %v188_v60, %v188_v60 }
 0x1f5   :  { %v195_v63 = vsel %vm178_vm3, %v191_v61, 0.0 }
 0x1f6   :  { %196 = vadd.xlane.f32.xlu1 %v195_v63  ;;  %v192_v0 = vsel %vm178_vm3, %v190_v62, 0.0 }
 0x1f7   :  { %193 = vadd.xlane.f32.xlu0 %v192_v0 }
 0x283   :  { %v197_v3 = vpop.xlane.xlu1 %196 }
 0x284   :  { %v199_v4 = vmul.f32 0.03125, %v197_v3  ;;  %v194_v5 = vpop.xlane.xlu0 %193 }
 0x285   :  { %v198_v6 = vmul.f32 0.03125, %v194_v5 }
 0x286   :  { %v201_v7 = vadd.f32 1e-12, %v199_v4 }
 0x287   :  { %v200_v8 = vadd.f32 1e-12, %v198_v6 }
 0x288   :  { %2509 = vrsqrt.f32 %v201_v7 }
 0x289   :  { %2511 = vrsqrt.f32 %v200_v8 }
 0x292   :  { %v2510_v9 = vpop.eup %2509 }
 0x293   :  { %v2512_v11 = vpop.eup %2511  ;;  %v205_v12 = vmul.f32 %v2510_v9, %v189_v59 }
 0x294   :  { %v204_v14 = vmul.f32 %v2512_v11, %v188_v60 }
 0x295   :  { %v211_v16 = vmul.f32 %v2149_v10, %v205_v12 }
 0x296   :  { %v210_v17 = vmul.f32 %v2149_v10, %v204_v14 }
 0x297   :  { %v2714_v18 = vadd.f32 %v2150_v15, %v211_v16 }
 0x298   :  { %v2716_v19 = vadd.f32 %v2150_v15, %v210_v17 }
 0x29a   :  { %v218_v20 = vpack.c.bf16 %v2714_v18, %v2716_v19 }
 0x29c   :  { %2306 = vmatmul.mubr.msk.bf16.vlgmr.msra.gmra.mrb[0].mxu1 %vm178_vm3, %v218_v20 }
 0x29d   :  { %2311 = vmatprep.mubr.msk.f32.mxu1 %vm2586_vm4, %v2584_v13 }
 0x36f   :  { %v277_v22 = vpop.f32.mrb[0].mxu1 }
 0x370   :  { %v2726_v23 = vadd.f32 %v2151_v21, %v277_v22  ;;  %v2307_v24 = vpop.f32.mrb[1].mxu1 }
 0x371   :  { %v280_v25 = vpop.f32.mrb[2].mxu1 }
 0x372   :  { %v2728_v26 = vadd.f32 %v2151_v21, %v280_v25  ;;  %321 = vrot.lane.b32.xlu0 %v2726_v23, %s2587_s11  ;;  %v2308_v27 = vpop.f32.mrb[3].mxu1 }
 0x374   :  { %399 = vrot.lane.b32.xlu1 %v2728_v26, %s2587_s11 }
 0x3e4   :  { %v322_v29 = vpop.permute.xlu0 %321 }
 0x3e5   :  { %2310 = vmatpush3.xpose.msk.msra.mxu1 %vm323_vm5, %v322_v29 }
 0x3e6   :  { %2314 = vmatprep.subr.mxu1 %v2584_v13  ;;  %v400_v30 = vpop.permute.xlu1 %399 }
 0x3e8   :  { %2312 = vmatmul.mubr.msk.f32.vlgmr.msra.gmra.mrb[4].mxu1 %vm323_vm5, %v2726_v23 }
 0x3e9   :  { %2315 = vmatpush3.xpose.msk.msra.mxu1 %vm323_vm5, %v400_v30  ;;  %2316 = vmatprep.mubr.msk.f32.mxu1 %vm2586_vm4, %v2584_v13 }
 0x3ea   :  { %2319 = vmatprep.subr.mxu1 %v2584_v13 }
 0x3ec   :  { %2317 = vmatmul.mubr.msk.f32.vlgmr.msra.gmra.mrb[6].mxu1 %vm323_vm5, %v2728_v26 }
 0x3ed   :  { %2321 = vmatprep.mubr.msk.f32.mxu1 %vm2586_vm4, %v2584_v13 }
 0x4bb   :  { %v394_v45 = vpop.f32.mrb[4].mxu1 }
 0x4bc   :  { %v395_v46 = vadd.f32 %v394_v45, %v2748_v43  ;;  %v2313_v47 = vpop.f32.mrb[5].mxu1 }
 0x4be   :  { %v475_v49 = vsel %vm323_vm5, %v395_v46, -inf }
 0x4bf   :  { %476 = vmax.xlane.f32.xlu1 %v475_v49  ;;  %v471_v28 = vpop.f32.mrb[6].mxu1 }
 0x4c0   :  { %v472_v50 = vadd.f32 %v471_v28, %v2751_v48  ;;  %v2318_v51 = vpop.f32.mrb[7].mxu1 }
 0x4c2   :  { %v478_v52 = vsel %vm323_vm5, %v472_v50, -inf }
 0x4c3   :  { %479 = vmax.xlane.f32.xlu0 %v478_v52 }
 0x4d0   :  { %573 = vrot.lane.b32.xlu1 %v2728_v26, %s2589_s1 }
 0x4d4   :  { %651 = vrot.lane.b32.xlu1 %v2726_v23, %s2590_s14 }
 0x54c   :  { %v477_v53 = vpop.xlane.xlu1 %476 }
 0x54d   :  { %v481_v54 = vsub.f32 %v395_v46, %v477_v53 }
 0x54f   :  { %v483_v55 = vmul.f32 1.442695, %v481_v54 }
 0x550   :  { %v574_v56 = vpop.permute.xlu1 %573  ;;  %v480_v57 = vpop.xlane.xlu0 %479 }
 0x551   :  { %2513 = vpow2.f32 %v483_v55  ;;  %v482_v58 = vsub.f32 %v472_v50, %v480_v57 }
 0x553   :  { %v485_v59 = vmul.f32 1.442695, %v482_v58 }
 0x554   :  { %v652_v60 = vpop.permute.xlu1 %651 }
 0x555   :  { %2515 = vpow2.f32 %v485_v59  ;;  %2330 = vmatpush3.xpose.msk.msra.mxu0 %vm323_vm5, %v652_v60 }
 0x556   :  { %2339 = vmatprep.subr.mxu0 %v2584_v13 }
 0x55b   :  { %v2514_v61 = vpop.eup %2513 }
 0x55c   :  { %v487_v62 = vsel %vm323_vm5, %v2514_v61, 0.0 }
 0x55d   :  { %488 = vadd.xlane.f32.xlu0 %v487_v62 }
 0x55f   :  { %v2516_v63 = vpop.eup %2515 }
 0x560   :  { %v490_v0 = vsel %vm323_vm5, %v2516_v63, 0.0 }
 0x561   :  { %491 = vadd.xlane.f32.xlu1 %v490_v0 }
 0x572   :  { %649 = vrot.lane.b32.xlu1 %v2726_v23, %s2591_s15 }
 0x573   :  { %497 = vrot.lane.b32.xlu0 %v2726_v23, %s2589_s1 }
 0x577   :  { %729 = vrot.lane.b32.xlu0 %v2728_v26, %s2590_s14 }
 0x57b   :  { %727 = vrot.lane.b32.xlu0 %v2728_v26, %s2591_s15 }
 0x5ea   :  { %v489_v1 = vpop.xlane.xlu0 %488 }
 0x5eb   :  { %2517 = vrcp.f32 %v489_v1 }
 0x5ee   :  { %v492_v2 = vpop.xlane.xlu1 %491  ;;  %v498_v3 = vpop.permute.xlu0 %497 }
 0x5ef   :  { %2519 = vrcp.f32 %v492_v2  ;;  %2320 = vmatpush3.msra.mxu1 %v498_v3 }
 0x5f0   :  { %2324 = vmatprep.subr.mxu1 %v2584_v13 }
 0x5f2   :  { %v650_v4 = vpop.permute.xlu1 %649  ;;  %v730_v9 = vpop.permute.xlu0 %729 }
 0x5f3   :  { %2332 = vmatmul.mubr.msk.f32.vlgmr.msra.gmra.mrb[2].mxu0 %vm323_vm5, %v650_v4 }
 0x5f4   :  { %2341 = vmatprep.mubr.msk.f32.mxu0 %vm2586_vm4, %v2584_v13 }
 0x5f5   :  { %v2518_v5 = vpop.eup %2517 }
 0x5f6   :  { %v495_v6 = vmul.f32 %v2518_v5, %v2514_v61  ;;  %v728_v10 = vpop.permute.xlu0 %727 }
 0x5f8   :  { %2322 = vmatmul.mubr.msk.f32.vlgmr.msra.gmra.mrb[8].mxu1 %vm323_vm5, %v495_v6 }
 0x5f9   :  { %v2520_v7 = vpop.eup %2519  ;;  %2325 = vmatpush3.msra.mxu1 %v574_v56  ;;  %2326 = vmatprep.mubr.msk.f32.mxu1 %vm2586_vm4, %v2584_v13 }
 0x5fa   :  { %v496_v8 = vmul.f32 %v2520_v7, %v2516_v63  ;;  %2334 = vmatprep.subr.mxu1 %v2584_v13 }
 0x5fc   :  { %2327 = vmatmul.mubr.msk.f32.vlgmr.msra.gmra.mrb[10].mxu1 %vm323_vm5, %v496_v8 }
 0x5fd   :  { %2336 = vmatprep.mubr.msk.f32.mxu1 %vm2586_vm4, %v2584_v13 }
 0x600   :  { %2335 = vmatpush3.xpose.msk.msra.mxu1 %vm323_vm5, %v730_v9 }
 0x601   :  { %2344 = vmatprep.subr.mxu1 %v2584_v13 }
 0x603   :  { %2337 = vmatmul.mubr.msk.f32.vlgmr.msra.gmra.mrb[12].mxu1 %vm323_vm5, %v728_v10 }
 0x604   :  { %2346 = vmatprep.mubr.msk.f32.mxu1 %vm2586_vm4, %v2584_v13 }
 0x6c6   :  { %v723_v11 = vpop.f32.mrb[2].mxu0 }
 0x6c7   :  { %v724_v12 = vadd.f32 %v723_v11, %v2748_v43  ;;  %v2333_v14 = vpop.f32.mrb[3].mxu0 }
 0x6c9   :  { %v805_v15 = vsel %vm323_vm5, %v724_v12, -inf }
 0x6ca   :  { %806 = vmax.xlane.f32.xlu1 %v805_v15 }
 0x6cb   :  { %v2784_v16 = vpop.f32.mrb[8].mxu1 }
 0x6cc   :  { %v2323_v17 = vpop.f32.mrb[9].mxu1 }
 0x6cf   :  { %v2786_v20 = vpop.f32.mrb[10].mxu1 }
 0x6d0   :  { %v2328_v21 = vpop.f32.mrb[11].mxu1 }
 0x6d6   :  { %v801_v22 = vpop.f32.mrb[12].mxu1 }
 0x6d7   :  { %v802_v24 = vadd.f32 %v801_v22, %v2751_v48  ;;  %v2338_v25 = vpop.f32.mrb[13].mxu1 }
 0x6d9   :  { %v808_v27 = vsel %vm323_vm5, %v802_v24, -inf }
 0x6da   :  { %809 = vmax.xlane.f32.xlu0 %v808_v27 }
 0x6db   :  { %903 = vrot.lane.b32.xlu1 %v2728_v26, %s2592_s16 }
 0x6df   :  { %981 = vrot.lane.b32.xlu1 %v2726_v23, %s2593_s17 }
 0x757   :  { %v807_v29 = vpop.xlane.xlu1 %806 }
 0x758   :  { %v811_v30 = vsub.f32 %v724_v12, %v807_v29 }
 0x75a   :  { %v813_v31 = vmul.f32 1.442695, %v811_v30 }
 0x75b   :  { %v904_v32 = vpop.permute.xlu1 %903 }
 0x75c   :  { %2521 = vpow2.f32 %v813_v31  ;;  %2345 = vmatpush3.msra.mxu1 %v904_v32 }
 0x75d   :  { %2354 = vmatprep.subr.mxu1 %v2584_v13 }
 0x75f   :  { %v982_v44 = vpop.permute.xlu1 %981 }
 0x766   :  { %v2522_v33 = vpop.eup %2521 }
 0x767   :  { %v810_v34 = vpop.xlane.xlu0 %809  ;;  %v817_v35 = vsel %vm323_vm5, %v2522_v33, 0.0 }
 0x768   :  { %v812_v36 = vsub.f32 %v802_v24, %v810_v34  ;;  %818 = vadd.xlane.f32.xlu0 %v817_v35 }
 0x76a   :  { %v815_v37 = vmul.f32 1.442695, %v812_v36 }
 0x76c   :  { %2523 = vpow2.f32 %v815_v37 }
 0x776   :  { %v2524_v38 = vpop.eup %2523 }
 0x777   :  { %v820_v39 = vsel %vm323_vm5, %v2524_v38, 0.0 }
 0x778   :  { %821 = vadd.xlane.f32.xlu1 %v820_v39 }
 0x77e   :  { %827 = vrot.lane.b32.xlu0 %v2726_v23, %s2592_s16 }
 0x782   :  { %1059 = vrot.lane.b32.xlu0 %v2728_v26, %s2593_s17 }
 0x786   :  { %1057 = vrot.lane.b32.xlu0 %v2728_v26, %s2594_s18 }
 0x789   :  { %979 = vrot.lane.b32.xlu1 %v2726_v23, %s2594_s18 }
 0x7f5   :  { %v819_v40 = vpop.xlane.xlu0 %818 }
 0x7f6   :  { %2525 = vrcp.f32 %v819_v40 }
 0x7f9   :  { %v828_v41 = vpop.permute.xlu0 %827 }
 0x7fa   :  { %2340 = vmatpush3.msra.mxu0 %v828_v41 }
 0x7fb   :  { %2349 = vmatprep.subr.mxu0 %v2584_v13 }
 0x7fd   :  { %v1060_v28 = vpop.permute.xlu0 %1059 }
 0x800   :  { %v2526_v42 = vpop.eup %2525 }
 0x801   :  { %v825_v45 = vmul.f32 %v2526_v42, %v2522_v33  ;;  %v1058_v51 = vpop.permute.xlu0 %1057 }
 0x803   :  { %2342 = vmatmul.mubr.msk.f32.vlgmr.msra.gmra.mrb[4].mxu0 %vm323_vm5, %v825_v45 }
 0x804   :  { %2350 = vmatpush3.xpose.msk.msra.mxu0 %vm323_vm5, %v982_v44  ;;  %2351 = vmatprep.mubr.msk.f32.mxu0 %vm2586_vm4, %v2584_v13 }
 0x805   :  { %v822_v46 = vpop.xlane.xlu1 %821  ;;  %2359 = vmatprep.subr.mxu0 %v2584_v13 }
 0x806   :  { %2527 = vrcp.f32 %v822_v46 }
 0x809   :  { %v980_v47 = vpop.permute.xlu1 %979 }
 0x80a   :  { %2352 = vmatmul.mubr.msk.f32.vlgmr.msra.gmra.mrb[6].mxu0 %vm323_vm5, %v980_v47 }
 0x80b   :  { %2361 = vmatprep.mubr.msk.f32.mxu0 %vm2586_vm4, %v2584_v13 }
 0x810   :  { %v2528_v49 = vpop.eup %2527 }
 0x811   :  { %v826_v50 = vmul.f32 %v2528_v49, %v2524_v38 }
 0x813   :  { %2347 = vmatmul.mubr.msk.f32.vlgmr.msra.gmra.mrb[14].mxu1 %vm323_vm5, %v826_v50 }
 0x814   :  { %2355 = vmatpush3.xpose.msk.msra.mxu1 %vm323_vm5, %v1060_v28  ;;  %2356 = vmatprep.mubr.msk.f32.mxu1 %vm2586_vm4, %v2584_v13 }
 0x815   :  { %2364 = vmatprep.subr.mxu1 %v2584_v13 }
 0x817   :  { %2357 = vmatmul.mubr.msk.f32.vlgmr.msra.gmra.mrb[16].mxu1 %vm323_vm5, %v1058_v51 }
 0x818   :  { %2366 = vmatprep.mubr.msk.f32.mxu1 %vm2586_vm4, %v2584_v13 }
 0x8d6   :  { %v2816_v52 = vpop.f32.mrb[4].mxu0 }
 0x8d7   :  { %v2343_v53 = vpop.f32.mrb[5].mxu0 }
 0x8dd   :  { %v1053_v54 = vpop.f32.mrb[6].mxu0 }
 0x8de   :  { %v1054_v55 = vadd.f32 %v1053_v54, %v2748_v43  ;;  %v2353_v56 = vpop.f32.mrb[7].mxu0 }
 0x8e0   :  { %v1135_v57 = vsel %vm323_vm5, %v1054_v55, -inf }
 0x8e1   :  { %1136 = vmax.xlane.f32.xlu1 %v1135_v57 }
 0x8e6   :  { %v2820_v58 = vpop.f32.mrb[14].mxu1 }
 0x8e7   :  { %v2480_v59 = vpack.i.bf16 %v2820_v58, %v2816_v52  ;;  %v2348_v60 = vpop.f32.mrb[15].mxu1  ;;  %v2497_v58 = vld [vmem:[%s2984_s4 + $0x10] sm:$0xff]  }
 0x8ea   :  { %v1131_v61 = vpop.f32.mrb[16].mxu1 }
 0x8eb   :  { %v1132_v62 = vadd.f32 %v1131_v61, %v2751_v48  ;;  %v2358_v63 = vpop.f32.mrb[17].mxu1 }
 0x8ed   :  { %v1138_v0 = vsel %vm323_vm5, %v1132_v62, -inf }
 0x8ee   :  { %1139 = vmax.xlane.f32.xlu0 %v1138_v0 }
 0x8f2   :  { %1233 = vrot.lane.b32.xlu1 %v2728_v26, %s2595_s19 }
 0x8f6   :  { %1311 = vrot.lane.b32.xlu1 %v2726_v23, %s2596_s20 }
 0x96e   :  { %v1137_v1 = vpop.xlane.xlu1 %1136 }
 0x96f   :  { %v1141_v2 = vsub.f32 %v1054_v55, %v1137_v1 }
 0x971   :  { %v1143_v3 = vmul.f32 1.442695, %v1141_v2 }
 0x972   :  { %v1234_v4 = vpop.permute.xlu1 %1233 }
 0x973   :  { %2529 = vpow2.f32 %v1143_v3  ;;  %2365 = vmatpush3.msra.mxu1 %v1234_v4 }
 0x974   :  { %2374 = vmatprep.subr.mxu1 %v2584_v13 }
 0x976   :  { %v1312_v15 = vpop.permute.xlu1 %1311 }
 0x97b   :  { %v1140_v5 = vpop.xlane.xlu0 %1139 }
 0x97c   :  { %v1142_v6 = vsub.f32 %v1132_v62, %v1140_v5  ;;  %v2498_v62 = vld [vmem:[%s2984_s4 + $0x18] sm:$0xff]  }
 0x97d   :  { %v2530_v7 = vpop.eup %2529 }
 0x97e   :  { %v1145_v8 = vmul.f32 1.442695, %v1142_v6  ;;  %v1147_v9 = vsel %vm323_vm5, %v2530_v7, 0.0 }
 0x97f   :  { %1148 = vadd.xlane.f32.xlu0 %v1147_v9 }
 0x980   :  { %2531 = vpow2.f32 %v1145_v8 }
 0x98a   :  { %v2532_v10 = vpop.eup %2531 }
 0x98b   :  { %v1150_v11 = vsel %vm323_vm5, %v2532_v10, 0.0 }
 0x98c   :  { %1151 = vadd.xlane.f32.xlu1 %v1150_v11 }
 0x995   :  { %1157 = vrot.lane.b32.xlu0 %v2726_v23, %s2595_s19 }
 0x999   :  { %1389 = vrot.lane.b32.xlu0 %v2728_v26, %s2596_s20 }
 0x99d   :  { %1387 = vrot.lane.b32.xlu0 %v2728_v26, %s2597_s21  ;;  %1309 = vrot.lane.b32.xlu1 %v2726_v23, %s2597_s21 }
 0xa0c   :  { %v1149_v12 = vpop.xlane.xlu0 %1148 }
 0xa0d   :  { %2533 = vrcp.f32 %v1149_v12 }
 0xa10   :  { %v1158_v14 = vpop.permute.xlu0 %1157 }
 0xa11   :  { %2360 = vmatpush3.msra.mxu0 %v1158_v14 }
 0xa12   :  { %2369 = vmatprep.subr.mxu0 %v2584_v13 }
 0xa14   :  { %v1390_v27 = vpop.permute.xlu0 %1389 }
 0xa17   :  { %v2534_v17 = vpop.eup %2533 }
 0xa18   :  { %v1155_v21 = vmul.f32 %v2534_v17, %v2530_v7  ;;  %v1388_v30 = vpop.permute.xlu0 %1387 }
 0xa19   :  { %v1152_v22 = vpop.xlane.xlu1 %1151 }
 0xa1a   :  { %2535 = vrcp.f32 %v1152_v22  ;;  %2362 = vmatmul.mubr.msk.f32.vlgmr.msra.gmra.mrb[8].mxu0 %vm323_vm5, %v1155_v21 }
 0xa1b   :  { %2370 = vmatpush3.xpose.msk.msra.mxu0 %vm323_vm5, %v1312_v15  ;;  %2371 = vmatprep.mubr.msk.f32.mxu0 %vm2586_vm4, %v2584_v13 }
 0xa1c   :  { %2379 = vmatprep.subr.mxu0 %v2584_v13 }
 0xa1d   :  { %v1310_v24 = vpop.permute.xlu1 %1309 }
 0xa1e   :  { %2372 = vmatmul.mubr.msk.f32.vlgmr.msra.gmra.mrb[10].mxu0 %vm323_vm5, %v1310_v24 }
 0xa1f   :  { %2381 = vmatprep.mubr.msk.f32.mxu0 %vm2586_vm4, %v2584_v13 }
 0xa24   :  { %v2536_v25 = vpop.eup %2535 }
 0xa25   :  { %v1156_v29 = vmul.f32 %v2536_v25, %v2532_v10 }
 0xa27   :  { %2367 = vmatmul.mubr.msk.f32.vlgmr.msra.gmra.mrb[18].mxu1 %vm323_vm5, %v1156_v29 }
 0xa28   :  { %2375 = vmatpush3.xpose.msk.msra.mxu1 %vm323_vm5, %v1390_v27  ;;  %2376 = vmatprep.mubr.msk.f32.mxu1 %vm2586_vm4, %v2584_v13 }
 0xa29   :  { %2384 = vmatprep.subr.mxu1 %v2584_v13 }
 0xa2b   :  { %2377 = vmatmul.mubr.msk.f32.vlgmr.msra.gmra.mrb[20].mxu1 %vm323_vm5, %v1388_v30 }
 0xa2c   :  { %2386 = vmatprep.mubr.msk.f32.mxu1 %vm2586_vm4, %v2584_v13 }
 0xaed   :  { %v1229_v31 = vpop.f32.mrb[8].mxu0 }
 0xaee   :  { %v2363_v32 = vpop.f32.mrb[9].mxu0 }
 0xaf1   :  { %v1383_v33 = vpop.f32.mrb[10].mxu0 }
 0xaf2   :  { %v1384_v34 = vadd.f32 %v1383_v33, %v2748_v43  ;;  %v2373_v35 = vpop.f32.mrb[11].mxu0 }
 0xaf4   :  { %v1465_v36 = vsel %vm323_vm5, %v1384_v34, -inf }
 0xaf5   :  { %1466 = vmax.xlane.f32.xlu1 %v1465_v36 }
 0xafa   :  { %v1305_v37 = vpop.f32.mrb[18].mxu1 }
 0xafb   :  { %v2485_v38 = vpack.i.bf16 %v1305_v37, %v1229_v31  ;;  %v2368_v39 = vpop.f32.mrb[19].mxu1 }
 0xafe   :  { %v1461_v40 = vpop.f32.mrb[20].mxu1 }
 0xaff   :  { %v1462_v41 = vadd.f32 %v1461_v40, %v2751_v48  ;;  %v2378_v42 = vpop.f32.mrb[21].mxu1 }
 0xb01   :  { %v1468_v44 = vsel %vm323_vm5, %v1462_v41, -inf }
 0xb02   :  { %1469 = vmax.xlane.f32.xlu0 %v1468_v44 }
 0xb82   :  { %v1467_v45 = vpop.xlane.xlu1 %1466 }
 0xb83   :  { %v1471_v46 = vsub.f32 %v1384_v34, %v1467_v45  ;;  %v2500_v45 = vld [vmem:[%s2984_s4 + $0x28] sm:$0xff]  }
 0xb85   :  { %v1473_v47 = vmul.f32 1.442695, %v1471_v46 }
 0xb87   :  { %2537 = vpow2.f32 %v1473_v47 }
 0xb8f   :  { %v1470_v49 = vpop.xlane.xlu0 %1469 }
 0xb90   :  { %v1472_v43 = vsub.f32 %v1462_v41, %v1470_v49 }
 0xb91   :  { %v2538_v28 = vpop.eup %2537 }
 0xb92   :  { %v1475_v50 = vmul.f32 1.442695, %v1472_v43  ;;  %v1477_v51 = vsel %vm323_vm5, %v2538_v28, 0.0 }
 0xb93   :  { %1478 = vadd.xlane.f32.xlu0 %v1477_v51 }
 0xb94   :  { %2539 = vpow2.f32 %v1475_v50 }
 0xb9e   :  { %v2540_v53 = vpop.eup %2539 }
 0xb9f   :  { %v1480_v54 = vsel %vm323_vm5, %v2540_v53, 0.0 }
 0xba0   :  { %1481 = vadd.xlane.f32.xlu1 %v1480_v54  ;;  %v2183_v54 = vld [vmem:[%s2983_s3 + $0x4] ss:$0 sm:$0xff] }
 0xba9   :  { %1487 = vrot.lane.b32.xlu0 %v2726_v23, %s2598_s22 }
 0xbad   :  { %2486 = vrot.lane.b32.xlu0 %v2485_v38, %s2599_s23 }
 0xbb1   :  { %1563 = vrot.lane.b32.xlu1 %v2728_v26, %s2598_s22 }
 0xbb5   :  { %2481 = vrot.lane.b32.xlu1 %v2480_v59, %s2600_s24 }
 0xc20   :  { %v1479_v48 = vpop.xlane.xlu0 %1478 }
 0xc21   :  { %2541 = vrcp.f32 %v1479_v48 }
 0xc24   :  { %v1488_v55 = vpop.permute.xlu0 %1487 }
 0xc25   :  { %2380 = vmatpush3.msra.mxu0 %v1488_v55 }
 0xc26   :  { %2389 = vmatprep.subr.bf16.mxu0 %v2584_v13 }
 0xc28   :  { %v2487_v5 = vpop.permute.xlu0 %2486 }
 0xc29   :  { %v2489_v8 = vunpack.i.h.bf16 %v2487_v5  ;;  %v2488_v9 = vunpack.i.l.bf16 %v2487_v5 }
 0xc2b   :  { %v2542_v56 = vpop.eup %2541 }
 0xc2c   :  { %v1485_v57 = vmul.f32 %v2542_v56, %v2538_v28 }
 0xc2d   :  { %v1482_v60 = vpop.xlane.xlu1 %1481 }
 0xc2e   :  { %2543 = vrcp.f32 %v1482_v60  ;;  %2382 = vmatmul.mubr.msk.f32.vlgmr.msra.gmra.mrb[12].mxu0 %vm323_vm5, %v1485_v57  ;;  %v2184_v57 = vld [vmem:[%s2983_s3 + $0x5] ss:$0 sm:$0xff] }
 0xc2f   :  { %2393 = vmatprep.mubr.msk.bf16.mxu0 %vm2586_vm4, %v2584_v13  ;;  %2390 = vmatpush3.bf16.msra.mxu0 %v2497_v58  ;;  %v2501_v58 = vld [vmem:[%s2984_s4 + $0x30] sm:$0xff]  }
 0xc30   :  { %2391 = vmatprep.subr.bf16.mxu0 %v2584_v13 }
 0xc31   :  { %v1564_v23 = vpop.permute.xlu1 %1563 }
 0xc32   :  { %2385 = vmatpush3.msra.mxu1 %v1564_v23 }
 0xc33   :  { %2397 = vmatprep.subr.bf16.mxu1 %v2584_v13  ;;  %2392 = vmatpush3.bf16.msra.mxu0 %v2498_v62  ;;  %v2504_v62 = vld [vmem:[%s2984_s4 + $0x48] sm:$0xff]  }
 0xc34   :  { %2405 = vmatprep.subr.bf16.mxu0 %v2584_v13 }
 0xc35   :  { %v2482_v2 = vpop.permute.xlu1 %2481 }
 0xc36   :  { %v2484_v3 = vunpack.i.h.bf16 %v2482_v2  ;;  %v2483_v4 = vunpack.i.l.bf16 %v2482_v2 }
 0xc38   :  { %v2544_v26 = vpop.eup %2543  ;;  %v1664_v6 = vsel %vm323_vm5, %v2786_v20, %v2484_v3  ;;  %v1663_v7 = vsel %vm323_vm5, %v2784_v16, %v2483_v4  ;;  %v2179_v16 = vld [vmem:[%s2983_s3 + $0x3] ss:$0 sm:$0xff] }
 0xc39   :  { %v1486_v52 = vmul.f32 %v2544_v26, %v2540_v53  ;;  %v1666_v14 = vsel %vm1665_vm6, %v1663_v7, %v2488_v9  ;;  %v1667_v15 = vsel %vm1665_vm6, %v1664_v6, %v2489_v8 }
 0xc3b   :  { %2387 = vmatmul.mubr.msk.f32.vlgmr.msra.gmra.mrb[22].mxu1 %vm323_vm5, %v1486_v52 }
 0xc3c   :  { %2401 = vmatprep.mubr.msk.bf16.mxu1 %vm2586_vm4, %v2584_v13 }
 0xd01   :  { %v1559_v59 = vpop.f32.mrb[12].mxu0 }
 0xd02   :  { %v2383_v61 = vpop.f32.mrb[13].mxu0 }
 0xd03   :  { %v2503_v61 = vld [vmem:[%s2984_s4 + $0x40] sm:$0xff]  }
 0xd0e   :  { %v1635_v63 = vpop.f32.mrb[22].mxu1 }
 0xd0f   :  { %v2490_v0 = vpack.i.bf16 %v1635_v63, %v1559_v59  ;;  %v2388_v1 = vpop.f32.mrb[23].mxu1  ;;  %v2502_v59 = vld [vmem:[%s2984_s4 + $0x38] sm:$0xff]   ;;  %v2185_v63 = vld [vmem:[%s2983_s3 + $0x6] ss:$0 sm:$0xff] }
 0xd11   :  { %2491 = vrot.lane.b32.xlu1 %v2490_v0, %s2601_s28 }
 0xd83   :  { %v2492_v10 = vpop.permute.xlu1 %2491 }
 0xd84   :  { %v2494_v11 = vunpack.i.h.bf16 %v2492_v10  ;;  %v2493_v12 = vunpack.i.l.bf16 %v2492_v10 }
 0xd86   :  { %v1670_v17 = vsel %vm1668_vm7, %v1667_v15, %v2494_v11  ;;  %v1669_v21 = vsel %vm1668_vm7, %v1666_v14, %v2493_v12 }
 0xd87   :  { %v1671_v22 = vpack.c.bf16 %v1670_v17, %v1669_v21 }
 0xd89   :  { %2394 = vmatmul.mubr.msk.bf16.vlgmr.msra.gmra.mrb[16].mxu0 %vm178_vm3, %v1671_v22 }
 0xd8a   :  { %2413 = vmatprep.mubr.msk.bf16.mxu0 %vm2586_vm4, %v2584_v13  ;;  %2406 = vmatpush3.bf16.msra.mxu0 %v2501_v58  ;;  %v2196_v58 = vld [vmem:[%s2983_s3 + $0x9] ss:$0 sm:$0xff] }
 0xd8b   :  { %2407 = vmatprep.subr.bf16.mxu0 %v2584_v13 }
 0xd8e   :  { %2408 = vmatpush3.bf16.msra.mxu0 %v2502_v59 }
 0xd8f   :  { %2409 = vmatprep.subr.bf16.mxu0 %v2584_v13 }
 0xd92   :  { %2410 = vmatpush3.bf16.msra.mxu0 %v2503_v61 }
 0xd93   :  { %2411 = vmatprep.subr.bf16.mxu0 %v2584_v13 }
 0xd96   :  { %2412 = vmatpush3.bf16.msra.mxu0 %v2504_v62 }
 0xe5c   :  { %v1730_v20 = vpop.f32.mrb[16].mxu0 }
 0xe5d   :  { %v1731_v24 = vadd.f32 %v2179_v16, %v1730_v20  ;;  %v2395_v25 = vpop.f32.mrb[17].mxu0 }
 0xe5e   :  { %v1733_v27 = vpop.f32.mrb[18].mxu0 }
 0xe5f   :  { %v1734_v29 = vadd.f32 %v2179_v16, %v1733_v27  ;;  %v2396_v30 = vpop.f32.mrb[19].mxu0  ;;  %v1737_v31 = vadd.f32 %v1731_v24, %v2716_v19 }
 0xe61   :  { %v1741_v32 = vsel %vm178_vm3, %v1737_v31, 0.0  ;;  %v1738_v33 = vadd.f32 %v1734_v29, %v2714_v18  ;;  %v2499_v18 = vld [vmem:[%s2984_s4 + $0x20] sm:$0xff]  }
 0xe62   :  { %1742 = vadd.xlane.f32.xlu0 %v1741_v32  ;;  %2398 = vmatpush3.bf16.msra.mxu1 %v2499_v18 }
 0xe63   :  { %v1744_v34 = vsel %vm178_vm3, %v1738_v33, 0.0  ;;  %2399 = vmatprep.subr.bf16.mxu1 %v2584_v13 }
 0xe64   :  { %1745 = vadd.xlane.f32.xlu1 %v1744_v34 }
 0xe66   :  { %2400 = vmatpush3.bf16.msra.mxu1 %v2500_v45 }
 0xe67   :  { %2417 = vmatprep.subr.bf16.mxu1 %v2584_v13 }
 0xeef   :  { %v1743_v35 = vpop.xlane.xlu0 %1742 }
 0xef0   :  { %v1747_v36 = vmul.f32 0.03125, %v1743_v35 }
 0xef1   :  { %v1746_v37 = vpop.xlane.xlu1 %1745 }
 0xef2   :  { %v1749_v38 = vsub.f32 %v1737_v31, %v1747_v36  ;;  %v1748_v39 = vmul.f32 0.03125, %v1746_v37  ;;  %v2189_v31 = vld [vmem:[%s2983_s3 + $0x7] ss:$0 sm:$0xff] }
 0xef4   :  { %v1750_v40 = vsub.f32 %v1738_v33, %v1748_v39  ;;  %v1751_v41 = vmul.f32 %v1749_v38, %v1749_v38 }
 0xef6   :  { %v1753_v42 = vsel %vm178_vm3, %v1751_v41, 0.0  ;;  %v1752_v44 = vmul.f32 %v1750_v40, %v1750_v40 }
 0xef7   :  { %1754 = vadd.xlane.f32.xlu0 %v1753_v42 }
 0xef8   :  { %v1756_v19 = vsel %vm178_vm3, %v1752_v44, 0.0 }
 0xefb   :  { %1757 = vadd.xlane.f32.xlu0 %v1756_v19 }
 0xf84   :  { %v1755_v46 = vpop.xlane.xlu0 %1754 }
 0xf85   :  { %v1759_v47 = vmul.f32 0.03125, %v1755_v46 }
 0xf87   :  { %v1761_v49 = vadd.f32 1e-12, %v1759_v47 }
 0xf88   :  { %v1758_v43 = vpop.xlane.xlu0 %1757 }
 0xf89   :  { %2545 = vrsqrt.f32 %v1761_v49  ;;  %v1760_v28 = vmul.f32 0.03125, %v1758_v43 }
 0xf8b   :  { %v1762_v50 = vadd.f32 1e-12, %v1760_v28 }
 0xf8d   :  { %2547 = vrsqrt.f32 %v1762_v50  ;;  %v2505_v50 = vld [vmem:[%s2984_s4 + $0x50] sm:$0xff]  }
 0xf93   :  { %v2546_v51 = vpop.eup %2545 }
 0xf94   :  { %v1765_v53 = vmul.f32 %v2546_v51, %v1749_v38  ;;  %v2506_v51 = vld [vmem:[%s2984_s4 + $0x58] sm:$0xff]  }
 0xf96   :  { %v1771_v55 = vmul.f32 %v2183_v54, %v1765_v53 }
 0xf97   :  { %v2548_v48 = vpop.eup %2547 }
 0xf98   :  { %v1766_v56 = vmul.f32 %v2548_v48, %v1750_v40  ;;  %v1777_v23 = vadd.f32 %v2184_v57, %v1771_v55 }
 0xf9a   :  { %v1772_v60 = vmul.f32 %v2183_v54, %v1766_v56 }
 0xf9c   :  { %v1778_v26 = vadd.f32 %v2184_v57, %v1772_v60 }
 0xf9e   :  { %v1779_v52 = vpack.c.bf16 %v1778_v26, %v1777_v23 }
 0xfa0   :  { %2402 = vmatmul.mubr.msk.bf16.vlgmr.msra.gmra.mrb[24].mxu1 %vm178_vm3, %v1779_v52 }
 0xfa1   :  { %2421 = vmatprep.mubr.msk.bf16.mxu1 %vm2586_vm4, %v2584_v13  ;;  %2418 = vmatpush3.bf16.msra.mxu1 %v2505_v50 }
 0xfa2   :  { %2419 = vmatprep.subr.bf16.mxu1 %v2584_v13 }
 0xfa5   :  { %2420 = vmatpush3.bf16.msra.mxu1 %v2506_v51 }
 0xfa6   :  { %2425 = vmatprep.subr.bf16.mxu1 %v2584_v13 }
0x1073   :  { %v1838_v0 = vpop.f32.mrb[24].mxu1 }
0x1074   :  { %v1839_v1 = vadd.f32 %v2185_v63, %v1838_v0  ;;  %v2403_v2 = vpop.f32.mrb[25].mxu1 }
0x1075   :  { %v1841_v3 = vpop.f32.mrb[26].mxu1 }
0x1076   :  { %v1847_v4 = vmul.f32 0.044715, %v1839_v1  ;;  %v1842_v5 = vadd.f32 %v2185_v63, %v1841_v3  ;;  %v2404_v6 = vpop.f32.mrb[27].mxu1  ;;  %v1845_v20 = vmul.f32 0.5, %v1839_v1 }
0x1078   :  { %v1849_v7 = vmul.f32 %v1847_v4, %v1839_v1  ;;  %v1848_v8 = vmul.f32 0.044715, %v1842_v5  ;;  %v1846_v24 = vmul.f32 0.5, %v1842_v5 }
0x107a   :  { %v1851_v9 = vmul.f32 %v1849_v7, %v1839_v1  ;;  %v1850_v10 = vmul.f32 %v1848_v8, %v1842_v5  ;;  %v2507_v8 = vld [vmem:[%s2984_s4 + $0x60] sm:$0xff]  }
0x107c   :  { %v1853_v11 = vadd.f32 %v1851_v9, %v1839_v1  ;;  %v1852_v12 = vmul.f32 %v1850_v10, %v1842_v5  ;;  %v2508_v9 = vld [vmem:[%s2984_s4 + $0x68] sm:$0xff]   ;;  %s2602_s4 = smov [#allocation2]  }
0x107d   :  { %v2197_v10 = vld [vmem:[%s2983_s3 + $0xa] ss:$0 sm:$0xff]  ;;  %s2135_s13 = sshll.u32 %s2602_s4, 4  ;;  %s2136_s13 = int_to_ptr.vmem [resolvable:$true] %s2135_s13 }
0x107e   :  { %v1855_v14 = vmul.f32 0.7978846, %v1853_v11  ;;  %v1854_v15 = vadd.f32 %v1852_v12, %v1842_v5  ;;  %s2559_s1 = scalar_lea.vmem %s2136_s13, 32  ;;  %p2564_p1 = scmp.lt.s32.totalorder %s2136_s13, %s2136_s13 }
0x107f   :  { %p2560_p0 = scmp.ne.s32.totalorder %s2136_s13, %s2559_s1  ;;  %p2565_p2 = scmp.lt.s32.totalorder %s2559_s1, %s2559_s1 }
0x1080   :  { %2549 = vtanh.f32 %v1855_v14  ;;  %v1856_v17 = vmul.f32 0.7978846, %v1854_v15 }
0x1081   :  { %p2566_p3 = por %p2565_p2, %p2564_p1 }
0x1082   :  { %2551 = vtanh.f32 %v1856_v17 }
0x1083   :  { %p2567_p4 = pnand %p2566_p3, %p2560_p0 }
0x108a   :  { %v2550_v21 = vpop.eup %2549 }
0x108b   :  { %v1859_v22 = vadd.f32 1.0, %v2550_v21 }
0x108c   :  { %v2552_v16 = vpop.eup %2551 }
0x108d   :  { %v1860_v25 = vadd.f32 1.0, %v2552_v16  ;;  %v1861_v27 = vmul.f32 %v1859_v22, %v1845_v20 }
0x108f   :  { %v1862_v29 = vmul.f32 %v1860_v25, %v1846_v24 }
0x1091   :  { %v1863_v30 = vpack.c.bf16 %v1862_v29, %v1861_v27 }
0x1093   :  { %2414 = vmatmul.mubr.msk.bf16.vlgmr.msra.gmra.mrb[20].mxu0 %vm1901_vm8, %v1863_v30 }
0x1166   :  { %v1939_v32 = vpop.f32.mrb[20].mxu0 }
0x1167   :  { %v1940_v33 = vadd.f32 %v2189_v31, %v1939_v32  ;;  %v2415_v34 = vpop.f32.mrb[21].mxu0 }
0x1168   :  { %v1942_v35 = vpop.f32.mrb[22].mxu0 }
0x1169   :  { %v1943_v36 = vadd.f32 %v2189_v31, %v1942_v35  ;;  %v2416_v37 = vpop.f32.mrb[23].mxu0  ;;  %v1946_v38 = vadd.f32 %v1940_v33, %v1777_v23  ;;  %v2195_v23 = vld [vmem:[%s2983_s3 + $0x8] ss:$0 sm:$0xff] }
0x116b   :  { %v1950_v39 = vsel %vm178_vm3, %v1946_v38, 0.0  ;;  %v1947_v40 = vadd.f32 %v1943_v36, %v1778_v26 }
0x116c   :  { %1951 = vadd.xlane.f32.xlu0 %v1950_v39 }
0x116d   :  { %v1953_v41 = vsel %vm178_vm3, %v1947_v40, 0.0 }
0x116e   :  { %1954 = vadd.xlane.f32.xlu1 %v1953_v41 }
0x11f9   :  { %v1952_v42 = vpop.xlane.xlu0 %1951 }
0x11fa   :  { %v1956_v44 = vmul.f32 0.03125, %v1952_v42 }
0x11fb   :  { %v1955_v19 = vpop.xlane.xlu1 %1954 }
0x11fc   :  { %v1958_v18 = vsub.f32 %v1946_v38, %v1956_v44  ;;  %v1957_v45 = vmul.f32 0.03125, %v1955_v19 }
0x11fe   :  { %v1959_v46 = vsub.f32 %v1947_v40, %v1957_v45  ;;  %v1960_v47 = vmul.f32 %v1958_v18, %v1958_v18 }
0x1200   :  { %v1962_v49 = vsel %vm178_vm3, %v1960_v47, 0.0  ;;  %v1961_v43 = vmul.f32 %v1959_v46, %v1959_v46 }
0x1201   :  { %1963 = vadd.xlane.f32.xlu0 %v1962_v49 }
0x1202   :  { %v1965_v28 = vsel %vm178_vm3, %v1961_v43, 0.0 }
0x1203   :  { %1966 = vadd.xlane.f32.xlu1 %v1965_v28 }
0x128e   :  { %v1964_v53 = vpop.xlane.xlu0 %1963 }
0x128f   :  { %v1968_v54 = vmul.f32 0.03125, %v1964_v53 }
0x1290   :  { %v1967_v48 = vpop.xlane.xlu1 %1966 }
0x1291   :  { %v1970_v55 = vadd.f32 1e-12, %v1968_v54  ;;  %v1969_v56 = vmul.f32 0.03125, %v1967_v48 }
0x1293   :  { %2553 = vrsqrt.f32 %v1970_v55  ;;  %v1971_v57 = vadd.f32 1e-12, %v1969_v56 }
0x1295   :  { %2555 = vrsqrt.f32 %v1971_v57 }
0x129d   :  { %v2554_v60 = vpop.eup %2553 }
0x129e   :  { %v1974_v26 = vmul.f32 %v2554_v60, %v1958_v18 }
0x129f   :  { %v2556_v52 = vpop.eup %2555 }
0x12a0   :  { %v1980_v59 = vmul.f32 %v2195_v23, %v1974_v26  ;;  %v1975_v61 = vmul.f32 %v2556_v52, %v1959_v46 }
0x12a2   :  { %v1986_v62 = vadd.f32 %v2196_v58, %v1980_v59  ;;  %v1981_v63 = vmul.f32 %v2195_v23, %v1975_v61 }
0x12a4   :  { %v1987_v0 = vadd.f32 %v2196_v58, %v1981_v63  ;;  %v1988_v1 = vpack.c.bf16 %v1986_v62, %v1986_v62 }
0x12a6   :  { %v1989_v2 = vpack.c.bf16 %v1987_v0, %v1987_v0  ;;  %v2001_v4 = vunpack.c.l.b16 %v1988_v1 }
0x12a8   :  { %v2002_v3 = vunpack.c.l.b16 %v1989_v2 }
0x12aa   :  { %v2003_v5 = vrot.slane %v2002_v3, 7 }
0x12ac   :  { %v2005_v6 = vsel %vm2004_vm9, %v2003_v5, %v2001_v4 }
0x12ad   :  { %v2006_v7 = vpack.c.b16 %v2005_v6, %v2005_v6 }
0x12af   :  { %2422 = vmatmul.mubr.msk.bf16.vlgmr.msra.gmra.mrb[28].mxu1 %vm178_vm3, %v2006_v7 }
0x12b0   :  { %2429 = vmatprep.mubr.msk.bf16.mxu1 %vm2586_vm4, %v2584_v13  ;;  %2426 = vmatpush3.bf16.msra.mxu1 %v2507_v8 }
0x12b1   :  { %2427 = vmatprep.subr.bf16.mxu1 %v2584_v13  ;;  %v2201_v13 = vld [vmem:[%s2983_s3 + $0xb] ss:$0 sm:$0xff] }
0x12b4   :  { %2428 = vmatpush3.bf16.msra.mxu1 %v2508_v9 }
0x1382   :  { %v2056_v11 = vpop.f32.mrb[28].mxu1 }
0x1383   :  { %v2057_v12 = vadd.f32 %v2197_v10, %v2056_v11  ;;  %v2423_v14 = vpop.f32.mrb[29].mxu1 }
0x1384   :  { %v2059_v15 = vpop.f32.mrb[30].mxu1 }
0x1385   :  { %2557 = vtanh.f32 %v2057_v12  ;;  %v2424_v17 = vpop.f32.mrb[31].mxu1 }
0x138f   :  { %v2558_v21 = vpop.eup %2557 }
0x1390   :  { %v2063_v22 = vpack.c.bf16 %v2558_v21, %v2558_v21 }
0x1392   :  { %2430 = vmatmul.mubr.msk.bf16.vlgmr.msra.gmra.mrb[32].mxu1 %vm178_vm3, %v2063_v22 }
0x1465   :  { %v2122_v16 = vpop.f32.mrb[32].mxu1 }
0x1466   :  { %v2123_v20 = vadd.f32 %v2201_v13, %v2122_v16  ;;  %v2431_v24 = vpop.f32.mrb[33].mxu1 }
0x1467   :  { %v2125_v25 = vpop.f32.mrb[34].mxu1 }
0x1468   :  { %2128 = vst [vmem:[#allocation2] sm:$0x3] %v2123_v20  ;;  %v2432_v27 = vpop.f32.mrb[35].mxu1 }
0x1469   :  { %2570 = shalt.err (!%p2567_p4)
}
0x146a   :  { %s2571_s3 = scalar_lea.hbm %s2985_s5, 32 }
0x146b   :  { %p2572_p5 = scmp.ne.s32.totalorder %s2985_s5, %s2571_s3  ;;  %p2575_p6 = scmp.lt.u32.totalorder %s2571_s3, %s2985_s5 }
0x146d   :  { %p2577_p7 = pnand %p2575_p6, %p2572_p5 }
0x146f   :  { %2580 = shalt.err (!%p2577_p7)
}
0x1470   :  { %2138 = dma.vmem_to_hbm [thread:$0]  %s2136_s13, 32, %s2985_s5, [#allocation3]  }
0x1471   :  { %2581 = dma.done.wait [#allocation3], 32  }
0x1472   :  { %2582 = vsyncadd [#allocation3], 4294967264 }
0x1473   :  { %2142 = vsyncpa [#allocation3], 1 }

</bundles_post_ra>
